<compile_context>
chip_gen: v5e
topology: v5e:2x2
jax: 0.10.0
libtpu: 0.0.40
codegen_flags: <defaults>
</compile_context>

<pallas_src>
import math
from functools import partial

import jax
import jax.numpy as jnp
from jax.experimental import pallas as pl
from jax.experimental.pallas import tpu as pltpu  # noqa: F401  (TPU backend registration)

# ---------------- model hyper-parameters (small, consistent with the module) --
VOCAB_SIZE = 50
EMB_DIM    = 32
N_LAYERS   = 2
N_HEADS    = 4
HEAD_DIM   = EMB_DIM // N_HEADS
FWD_DIM    = 64
MAX_LEN    = 16
N_CLASSES  = 2
PAD_IDX    = 0
BATCH      = 2
SEQ_LEN    = 8

BLN_W = 3 * EMB_DIM           # width of the packed bias / LayerNorm slab (96)


# ---------------- fused Pallas kernel: embedding + 2 blocks + classifier ------
def encoder_kernel(seq_ref, maskb_ref, emb_ref, pos_ref,
                   wsl_ref, w2_ref, bln_ref, wout_ref, bout_ref, out_ref,
                   *, batch, seq_len, emb_dim, heads, head_dim, fwd_dim, n_layers):
    B, S, E, H, D, F = batch, seq_len, emb_dim, heads, head_dim, fwd_dim
    M = B * S
    scale = 1.0 / math.sqrt(E)       # module uses 1/sqrt(emb_dim), not 1/sqrt(head_dim)
    eps = 1e-6                       # nn.LayerNorm(emb_dim, eps=1e-06)

    # ---- embedding lookup as a one-hot matmul (gather-free) + positional add ----
    vocab = emb_ref.shape[0]
    tok = seq_ref[...]                                              # (M, 1) int32
    onehot = (tok == jax.lax.broadcasted_iota(jnp.int32, (M, vocab), 1)
              ).astype(jnp.float32)                                 # (M, vocab)
    x = jnp.dot(onehot, emb_ref[...],
                preferred_element_type=jnp.float32) + pos_ref[...]  # (M, E)
    # nn.Dropout == identity in eval mode

    mask_bias = maskb_ref[...]                                      # (B, 1, S) additive key bias

    for l in range(n_layers):                                       # static unroll, L = 2
        wsl = wsl_ref[l]                                            # (E, 3E + E + F)
        w2  = w2_ref[l]                                             # (F, E)
        bln = bln_ref[l]                                            # (8, 3E)
        wqkv = wsl[:, :3 * E]                                       # (E, 3E)
        wfc  = wsl[:, 3 * E:4 * E]                                  # (E, E)
        w1   = wsl[:, 4 * E:4 * E + F]                              # (E, F)
        bqkv = bln[0:1, :3 * E]
        bfc  = bln[1:2, :E]
        b1   = bln[2:3, :F]
        b2   = bln[3:4, :E]
        g1, be1 = bln[4:5, :E], bln[5:6, :E]
        g2, be2 = bln[6:7, :E], bln[7:8, :E]

        # ---- fused Q/K/V projection, batch folded into M ----
        qkv = jnp.dot(x, wqkv, preferred_element_type=jnp.float32) + bqkv   # (M, 3E)
        qkv3 = qkv.reshape(B, S, 3 * E)                                     # (B, S, 3E)

        # ---- multi-head attention (static head unroll, batched einsums over B) ----
        head_outs = []
        for h in range(H):
            qh = qkv3[:, :, h * D:(h + 1) * D]                       # (B, S, D)
            kh = qkv3[:, :, E + h * D:E + (h + 1) * D]
            vh = qkv3[:, :, 2 * E + h * D:2 * E + (h + 1) * D]
            s = jnp.einsum('bqd,bkd->bqk', qh, kh,
                           preferred_element_type=jnp.float32)       # (B, S, S)
            s = (s + mask_bias) * scale                              # masked_fill then /sqrt(E)
            s = s - jnp.max(s, axis=-1, keepdims=True)               # stable softmax
            p = jnp.exp(s)
            p = p * pl.reciprocal(jnp.sum(p, axis=-1, keepdims=True), approx=True)
            head_outs.append(jnp.einsum('bqk,bkd->bqd', p, vh,
                                        preferred_element_type=jnp.float32))
        attn = jnp.concatenate(head_outs, axis=-1).reshape(M, E)      # (M, E)
        attn = jnp.dot(attn, wfc, preferred_element_type=jnp.float32) + bfc

        # ---- residual + LayerNorm1 (dropout == identity) ----
        h1 = attn + x
        mu1 = jnp.mean(h1, axis=-1, keepdims=True)
        var1 = jnp.mean((h1 - mu1) ** 2, axis=-1, keepdims=True)
        x1 = (h1 - mu1) * jax.lax.rsqrt(var1 + eps) * g1 + be1

        # ---- FFN: Linear -> ReLU -> Linear ----
        f = jnp.dot(x1, w1, preferred_element_type=jnp.float32) + b1
        f = jnp.maximum(f, 0.0)
        f = jnp.dot(f, w2, preferred_element_type=jnp.float32) + b2

        # ---- residual + LayerNorm2 ----
        h2 = f + x1
        mu2 = jnp.mean(h2, axis=-1, keepdims=True)
        var2 = jnp.mean((h2 - mu2) ** 2, axis=-1, keepdims=True)
        x = (h2 - mu2) * jax.lax.rsqrt(var2 + eps) * g2 + be2

    # ---- classifier head on token position 0 ----
    cls = x.reshape(B, S, E)[:, 0, :]                                 # (B, E)
    out_ref[...] = (jnp.dot(cls, wout_ref[...],
                            preferred_element_type=jnp.float32) + bout_ref[...])


# ---------------- deterministic parameter construction ------------------------
def spectral_normalize(w):
    # PyTorch spectral_norm divides W by its largest singular value (power iteration).
    # TODO(synk): PyTorch uses a 1-step power-iteration estimate of sigma; we use exact sigma.
    sigma = jnp.linalg.svd(w, compute_uv=False)[0]
    return w / sigma


def make_linear(key, out_dim, in_dim, spectral):
    k1, k2 = jax.random.split(key)
    bound = 1.0 / math.sqrt(in_dim)
    w = jax.random.uniform(k1, (out_dim, in_dim), jnp.float32, -bound, bound)
    b = jax.random.uniform(k2, (out_dim,), jnp.float32, -bound, bound)
    if spectral:
        w = spectral_normalize(w)
    return w, b


def make_block_params(key):
    keys = jax.random.split(key, 6)
    wq, bq = make_linear(keys[0], HEAD_DIM, HEAD_DIM, spectral=True)
    wk, bk = make_linear(keys[1], HEAD_DIM, HEAD_DIM, spectral=True)
    wv, bv = make_linear(keys[2], HEAD_DIM, HEAD_DIM, spectral=True)
    wfc, bfc = make_linear(keys[3], EMB_DIM, EMB_DIM, spectral=True)
    w1, b1 = make_linear(keys[4], FWD_DIM, EMB_DIM, spectral=True)
    w2, b2 = make_linear(keys[5], EMB_DIM, FWD_DIM, spectral=True)

    eye_h = jnp.eye(N_HEADS, dtype=jnp.float32)
    # Block-diagonal expansion: x @ kron(I, W.T) == per-head x_h @ W.T, all heads at once.
    wqkv = jnp.concatenate([jnp.kron(eye_h, wq.T),
                            jnp.kron(eye_h, wk.T),
                            jnp.kron(eye_h, wv.T)], axis=1)            # (E, 3E)
    wslab = jnp.concatenate([wqkv, wfc.T, w1.T], axis=1)               # (E, 3E + E + F)

    def row(v):
        r = jnp.zeros((BLN_W,), jnp.float32)
        return r.at[:v.shape[0]].set(v)

    bln = jnp.stack([
        row(jnp.concatenate([jnp.tile(bq, N_HEADS),
                             jnp.tile(bk, N_HEADS),
                             jnp.tile(bv, N_HEADS)])),                 # fused QKV bias (3E)
        row(bfc), row(b1), row(b2),
        row(jnp.ones((EMB_DIM,), jnp.float32)),  row(jnp.zeros((EMB_DIM,), jnp.float32)),  # LN1
        row(jnp.ones((EMB_DIM,), jnp.float32)),  row(jnp.zeros((EMB_DIM,), jnp.float32)),  # LN2
    ])                                                                 # (8, BLN_W)
    return wslab, w2.T, bln


def make_params(key):
    keys = jax.random.split(key, 3 + N_LAYERS)
    emb_table = 0.02 * jax.random.normal(keys[0], (VOCAB_SIZE, EMB_DIM), jnp.float32)
    pos_table = 0.02 * jax.random.normal(keys[1], (MAX_LEN, EMB_DIM), jnp.float32)
    w_out, b_out = make_linear(keys[2], N_CLASSES, EMB_DIM, spectral=False)
    blocks = [make_block_params(keys[3 + i]) for i in range(N_LAYERS)]
    return dict(
        emb_table=emb_table,
        pos_table=pos_table,
        w_out=w_out.T,                         # (E, n_classes)
        b_out=b_out[None, :],                  # (1, n_classes)
        wslabs=jnp.stack([b[0] for b in blocks]),   # (L, E, 3E+E+F)
        w2s=jnp.stack([b[1] for b in blocks]),      # (L, F, E)
        blns=jnp.stack([b[2] for b in blocks]),     # (L, 8, 3E)
    )


# ---------------- forward: one fused pallas_call -------------------------------
@jax.jit
def transformer_encoder_forward(seq, params):
    B, S = seq.shape
    seq_col = seq.reshape(B * S, 1).astype(jnp.int32)                         # (B*S, 1)
    # additive key-mask bias: 0 for real tokens, -1e20 for PAD (matches masked_fill)
    mask_bias = jnp.where(seq != PAD_IDX, 0.0, -1e20).astype(jnp.float32)[:, None, :]  # (B,1,S)
    pos_tiled = jnp.tile(params["pos_table"][:S], (B, 1))                     # (B*S, E), kind=None

    kernel = partial(encoder_kernel, batch=B, seq_len=S, emb_dim=EMB_DIM,
                     heads=N_HEADS, head_dim=HEAD_DIM, fwd_dim=FWD_DIM,
                     n_layers=N_LAYERS)

    # Single invocation, no grid: every operand is a whole-array VMEM block
    # (total resident data is a few hundred KB, far below VMEM on v5e/v6e/v7x).
    return pl.pallas_call(
        kernel,
        out_shape=jax.ShapeDtypeStruct((B, N_CLASSES), jnp.float32),
    )(seq_col, mask_bias, params["emb_table"], pos_tiled,
      params["wslabs"], params["w2s"], params["blns"],
      params["w_out"], params["b_out"])


if __name__ == "__main__":
    key = jax.random.PRNGKey(0)
    k_seq, k_params = jax.random.split(key)
    seq = jax.random.randint(k_seq, (BATCH, SEQ_LEN), 1, VOCAB_SIZE, dtype=jnp.int32)
    # introduce some padding tokens so the attention mask is exercised
    seq = seq.at[1, -2:].set(PAD_IDX)

    params = make_params(k_params)
    logits = transformer_encoder_forward(seq, params)
    jax.block_until_ready(logits)
    assert logits.shape == (BATCH, N_CLASSES)
    assert bool(jnp.all(jnp.isfinite(logits)))
    print("KERNEL_OK")
</pallas_src>

<mosaic_0001>
module attributes {stable_mosaic.version = 11 : i64} {
  func.func @encoder_kernel(%arg0: memref<16x1xi32, #tpu.memory_space<vmem>>, %arg1: memref<2x1x8xf32, #tpu.memory_space<vmem>>, %arg2: memref<50x32xf32, #tpu.memory_space<vmem>>, %arg3: memref<16x32xf32, #tpu.memory_space<vmem>>, %arg4: memref<2x32x192xf32, #tpu.memory_space<vmem>>, %arg5: memref<2x64x32xf32, #tpu.memory_space<vmem>>, %arg6: memref<2x8x96xf32, #tpu.memory_space<vmem>>, %arg7: memref<32x2xf32, #tpu.memory_space<vmem>>, %arg8: memref<1x2xf32, #tpu.memory_space<vmem>>, %arg9: memref<2x2xf32, #tpu.memory_space<vmem>>) attributes {dimension_semantics = [], scalar_prefetch = 0 : i64, scratch_operands = 0 : i64, tpu.core_type = #tpu.core_type<tc>} {
    %c0 = arith.constant 0 : index
    %c0_0 = arith.constant 0 : index
    %0 = vector.load %arg0[%c0, %c0_0] : memref<16x1xi32, #tpu.memory_space<vmem>>, vector<16x1xi32>
    %1 = tpu.iota {dimensions = array<i32: 1>} : vector<16x50xi32>
    %2 = vector.broadcast %0 : vector<16x1xi32> to vector<16x50xi32>
    %3 = arith.cmpi eq, %2, %1 : vector<16x50xi32>
    %4 = arith.extui %3 : vector<16x50xi1> to vector<16x50xi32>
    %5 = arith.sitofp %4 : vector<16x50xi32> to vector<16x50xf32>
    %c0_1 = arith.constant 0 : index
    %c0_2 = arith.constant 0 : index
    %6 = vector.load %arg2[%c0_1, %c0_2] : memref<50x32xf32, #tpu.memory_space<vmem>>, vector<50x32xf32>
    %cst = arith.constant dense<0.000000e+00> : vector<16x32xf32>
    %7 = tpu.matmul %5, %6, %cst {dimension_numbers = #tpu.dot_dimension_numbers<[1], [0], [0], [1], [0, 0, 1, 1], [], []>} : vector<16x50xf32>, vector<50x32xf32>, vector<16x32xf32> -> vector<16x32xf32>
    %c0_3 = arith.constant 0 : index
    %c0_4 = arith.constant 0 : index
    %8 = vector.load %arg3[%c0_3, %c0_4] : memref<16x32xf32, #tpu.memory_space<vmem>>, vector<16x32xf32>
    %9 = arith.addf %7, %8 : vector<16x32xf32>
    %c0_5 = arith.constant 0 : index
    %c0_6 = arith.constant 0 : index
    %c0_7 = arith.constant 0 : index
    %10 = vector.load %arg1[%c0_5, %c0_6, %c0_7] : memref<2x1x8xf32, #tpu.memory_space<vmem>>, vector<2x1x8xf32>
    %c0_8 = arith.constant 0 : index
    %c0_9 = arith.constant 0 : index
    %c0_10 = arith.constant 0 : index
    %11 = vector.load %arg4[%c0_8, %c0_9, %c0_10] : memref<2x32x192xf32, #tpu.memory_space<vmem>>, vector<1x32x192xf32>
    %12 = vector.shape_cast %11 : vector<1x32x192xf32> to vector<32x192xf32>
    %c0_11 = arith.constant 0 : index
    %c0_12 = arith.constant 0 : index
    %c0_13 = arith.constant 0 : index
    %13 = vector.load %arg5[%c0_11, %c0_12, %c0_13] : memref<2x64x32xf32, #tpu.memory_space<vmem>>, vector<1x64x32xf32>
    %14 = vector.shape_cast %13 : vector<1x64x32xf32> to vector<64x32xf32>
    %c0_14 = arith.constant 0 : index
    %c0_15 = arith.constant 0 : index
    %c0_16 = arith.constant 0 : index
    %15 = vector.load %arg6[%c0_14, %c0_15, %c0_16] : memref<2x8x96xf32, #tpu.memory_space<vmem>>, vector<1x8x96xf32>
    %16 = vector.shape_cast %15 : vector<1x8x96xf32> to vector<8x96xf32>
    %17 = vector.extract_strided_slice %12 {offsets = [0, 0], sizes = [32, 96], strides = [1, 1]} : vector<32x192xf32> to vector<32x96xf32>
    %18 = vector.extract_strided_slice %12 {offsets = [0, 96], sizes = [32, 32], strides = [1, 1]} : vector<32x192xf32> to vector<32x32xf32>
    %19 = vector.extract_strided_slice %12 {offsets = [0, 128], sizes = [32, 64], strides = [1, 1]} : vector<32x192xf32> to vector<32x64xf32>
    %20 = vector.extract_strided_slice %16 {offsets = [0, 0], sizes = [1, 96], strides = [1, 1]} : vector<8x96xf32> to vector<1x96xf32>
    %21 = vector.extract_strided_slice %16 {offsets = [1, 0], sizes = [1, 32], strides = [1, 1]} : vector<8x96xf32> to vector<1x32xf32>
    %22 = vector.extract_strided_slice %16 {offsets = [2, 0], sizes = [1, 64], strides = [1, 1]} : vector<8x96xf32> to vector<1x64xf32>
    %23 = vector.extract_strided_slice %16 {offsets = [3, 0], sizes = [1, 32], strides = [1, 1]} : vector<8x96xf32> to vector<1x32xf32>
    %24 = vector.extract_strided_slice %16 {offsets = [4, 0], sizes = [1, 32], strides = [1, 1]} : vector<8x96xf32> to vector<1x32xf32>
    %25 = vector.extract_strided_slice %16 {offsets = [5, 0], sizes = [1, 32], strides = [1, 1]} : vector<8x96xf32> to vector<1x32xf32>
    %26 = vector.extract_strided_slice %16 {offsets = [6, 0], sizes = [1, 32], strides = [1, 1]} : vector<8x96xf32> to vector<1x32xf32>
    %27 = vector.extract_strided_slice %16 {offsets = [7, 0], sizes = [1, 32], strides = [1, 1]} : vector<8x96xf32> to vector<1x32xf32>
    %cst_17 = arith.constant dense<0.000000e+00> : vector<16x96xf32>
    %28 = tpu.matmul %9, %17, %cst_17 {dimension_numbers = #tpu.dot_dimension_numbers<[1], [0], [0], [1], [0, 0, 1, 1], [], []>} : vector<16x32xf32>, vector<32x96xf32>, vector<16x96xf32> -> vector<16x96xf32>
    %29 = vector.broadcast %20 : vector<1x96xf32> to vector<16x96xf32>
    %30 = arith.addf %28, %29 : vector<16x96xf32>
    %31 = vector.shape_cast %30 : vector<16x96xf32> to vector<2x8x96xf32>
    %32 = vector.extract_strided_slice %31 {offsets = [0, 0, 0], sizes = [2, 8, 8], strides = [1, 1, 1]} : vector<2x8x96xf32> to vector<2x8x8xf32>
    %33 = vector.extract_strided_slice %31 {offsets = [0, 0, 32], sizes = [2, 8, 8], strides = [1, 1, 1]} : vector<2x8x96xf32> to vector<2x8x8xf32>
    %34 = vector.extract_strided_slice %31 {offsets = [0, 0, 64], sizes = [2, 8, 8], strides = [1, 1, 1]} : vector<2x8x96xf32> to vector<2x8x8xf32>
    "tpu.trace_start"() <{level = 10 : i32, message = "bqd,bkd->bqk"}> : () -> ()
    %cst_18 = arith.constant dense<0.000000e+00> : vector<2x8x8xf32>
    %35 = tpu.matmul %32, %33, %cst_18 {dimension_numbers = #tpu.dot_dimension_numbers<[2], [2], [1], [1], [0, 0, 0, 1, 1, 1], [0], [0]>} : vector<2x8x8xf32>, vector<2x8x8xf32>, vector<2x8x8xf32> -> vector<2x8x8xf32>
    "tpu.trace_stop"() : () -> ()
    %36 = vector.broadcast %10 : vector<2x1x8xf32> to vector<2x8x8xf32>
    %37 = arith.addf %35, %36 : vector<2x8x8xf32>
    %cst_19 = arith.constant 0.176776692 : f32
    %38 = vector.broadcast %cst_19 : f32 to vector<2x8x8xf32>
    %39 = arith.mulf %37, %38 : vector<2x8x8xf32>
    %cst_20 = arith.constant dense<0xFF800000> : vector<2x8xf32>
    %40 = vector.multi_reduction <maximumf>, %39, %cst_20 [2] : vector<2x8x8xf32> to vector<2x8xf32>
    %41 = vector.shape_cast %40 : vector<2x8xf32> to vector<2x8x1xf32>
    %42 = vector.broadcast %41 : vector<2x8x1xf32> to vector<2x8x8xf32>
    %43 = arith.subf %39, %42 : vector<2x8x8xf32>
    %44 = math.exp %43 : vector<2x8x8xf32>
    %cst_21 = arith.constant dense<0.000000e+00> : vector<2x8xf32>
    %45 = vector.multi_reduction <add>, %44, %cst_21 [2] : vector<2x8x8xf32> to vector<2x8xf32>
    %46 = vector.shape_cast %45 : vector<2x8xf32> to vector<2x8x1xf32>
    %47 = tpu.reciprocal %46 {approx = true} : vector<2x8x1xf32> -> vector<2x8x1xf32>
    %48 = vector.broadcast %47 : vector<2x8x1xf32> to vector<2x8x8xf32>
    %49 = arith.mulf %44, %48 : vector<2x8x8xf32>
    "tpu.trace_start"() <{level = 10 : i32, message = "bqk,bkd->bqd"}> : () -> ()
    %cst_22 = arith.constant dense<0.000000e+00> : vector<2x8x8xf32>
    %50 = tpu.matmul %49, %34, %cst_22 {dimension_numbers = #tpu.dot_dimension_numbers<[2], [1], [1], [2], [0, 0, 0, 1, 1, 2], [0], [0]>} : vector<2x8x8xf32>, vector<2x8x8xf32>, vector<2x8x8xf32> -> vector<2x8x8xf32>
    "tpu.trace_stop"() : () -> ()
    %51 = vector.extract_strided_slice %31 {offsets = [0, 0, 8], sizes = [2, 8, 8], strides = [1, 1, 1]} : vector<2x8x96xf32> to vector<2x8x8xf32>
    %52 = vector.extract_strided_slice %31 {offsets = [0, 0, 40], sizes = [2, 8, 8], strides = [1, 1, 1]} : vector<2x8x96xf32> to vector<2x8x8xf32>
    %53 = vector.extract_strided_slice %31 {offsets = [0, 0, 72], sizes = [2, 8, 8], strides = [1, 1, 1]} : vector<2x8x96xf32> to vector<2x8x8xf32>
    "tpu.trace_start"() <{level = 10 : i32, message = "bqd,bkd->bqk"}> : () -> ()
    %cst_23 = arith.constant dense<0.000000e+00> : vector<2x8x8xf32>
    %54 = tpu.matmul %51, %52, %cst_23 {dimension_numbers = #tpu.dot_dimension_numbers<[2], [2], [1], [1], [0, 0, 0, 1, 1, 1], [0], [0]>} : vector<2x8x8xf32>, vector<2x8x8xf32>, vector<2x8x8xf32> -> vector<2x8x8xf32>
    "tpu.trace_stop"() : () -> ()
    %55 = vector.broadcast %10 : vector<2x1x8xf32> to vector<2x8x8xf32>
    %56 = arith.addf %54, %55 : vector<2x8x8xf32>
    %cst_24 = arith.constant 0.176776692 : f32
    %57 = vector.broadcast %cst_24 : f32 to vector<2x8x8xf32>
    %58 = arith.mulf %56, %57 : vector<2x8x8xf32>
    %cst_25 = arith.constant dense<0xFF800000> : vector<2x8xf32>
    %59 = vector.multi_reduction <maximumf>, %58, %cst_25 [2] : vector<2x8x8xf32> to vector<2x8xf32>
    %60 = vector.shape_cast %59 : vector<2x8xf32> to vector<2x8x1xf32>
    %61 = vector.broadcast %60 : vector<2x8x1xf32> to vector<2x8x8xf32>
    %62 = arith.subf %58, %61 : vector<2x8x8xf32>
    %63 = math.exp %62 : vector<2x8x8xf32>
    %cst_26 = arith.constant dense<0.000000e+00> : vector<2x8xf32>
    %64 = vector.multi_reduction <add>, %63, %cst_26 [2] : vector<2x8x8xf32> to vector<2x8xf32>
    %65 = vector.shape_cast %64 : vector<2x8xf32> to vector<2x8x1xf32>
    %66 = tpu.reciprocal %65 {approx = true} : vector<2x8x1xf32> -> vector<2x8x1xf32>
    %67 = vector.broadcast %66 : vector<2x8x1xf32> to vector<2x8x8xf32>
    %68 = arith.mulf %63, %67 : vector<2x8x8xf32>
    "tpu.trace_start"() <{level = 10 : i32, message = "bqk,bkd->bqd"}> : () -> ()
    %cst_27 = arith.constant dense<0.000000e+00> : vector<2x8x8xf32>
    %69 = tpu.matmul %68, %53, %cst_27 {dimension_numbers = #tpu.dot_dimension_numbers<[2], [1], [1], [2], [0, 0, 0, 1, 1, 2], [0], [0]>} : vector<2x8x8xf32>, vector<2x8x8xf32>, vector<2x8x8xf32> -> vector<2x8x8xf32>
    "tpu.trace_stop"() : () -> ()
    %70 = vector.extract_strided_slice %31 {offsets = [0, 0, 16], sizes = [2, 8, 8], strides = [1, 1, 1]} : vector<2x8x96xf32> to vector<2x8x8xf32>
    %71 = vector.extract_strided_slice %31 {offsets = [0, 0, 48], sizes = [2, 8, 8], strides = [1, 1, 1]} : vector<2x8x96xf32> to vector<2x8x8xf32>
    %72 = vector.extract_strided_slice %31 {offsets = [0, 0, 80], sizes = [2, 8, 8], strides = [1, 1, 1]} : vector<2x8x96xf32> to vector<2x8x8xf32>
    "tpu.trace_start"() <{level = 10 : i32, message = "bqd,bkd->bqk"}> : () -> ()
    %cst_28 = arith.constant dense<0.000000e+00> : vector<2x8x8xf32>
    %73 = tpu.matmul %70, %71, %cst_28 {dimension_numbers = #tpu.dot_dimension_numbers<[2], [2], [1], [1], [0, 0, 0, 1, 1, 1], [0], [0]>} : vector<2x8x8xf32>, vector<2x8x8xf32>, vector<2x8x8xf32> -> vector<2x8x8xf32>
    "tpu.trace_stop"() : () -> ()
    %74 = vector.broadcast %10 : vector<2x1x8xf32> to vector<2x8x8xf32>
    %75 = arith.addf %73, %74 : vector<2x8x8xf32>
    %cst_29 = arith.constant 0.176776692 : f32
    %76 = vector.broadcast %cst_29 : f32 to vector<2x8x8xf32>
    %77 = arith.mulf %75, %76 : vector<2x8x8xf32>
    %cst_30 = arith.constant dense<0xFF800000> : vector<2x8xf32>
    %78 = vector.multi_reduction <maximumf>, %77, %cst_30 [2] : vector<2x8x8xf32> to vector<2x8xf32>
    %79 = vector.shape_cast %78 : vector<2x8xf32> to vector<2x8x1xf32>
    %80 = vector.broadcast %79 : vector<2x8x1xf32> to vector<2x8x8xf32>
    %81 = arith.subf %77, %80 : vector<2x8x8xf32>
    %82 = math.exp %81 : vector<2x8x8xf32>
    %cst_31 = arith.constant dense<0.000000e+00> : vector<2x8xf32>
    %83 = vector.multi_reduction <add>, %82, %cst_31 [2] : vector<2x8x8xf32> to vector<2x8xf32>
    %84 = vector.shape_cast %83 : vector<2x8xf32> to vector<2x8x1xf32>
    %85 = tpu.reciprocal %84 {approx = true} : vector<2x8x1xf32> -> vector<2x8x1xf32>
    %86 = vector.broadcast %85 : vector<2x8x1xf32> to vector<2x8x8xf32>
    %87 = arith.mulf %82, %86 : vector<2x8x8xf32>
    "tpu.trace_start"() <{level = 10 : i32, message = "bqk,bkd->bqd"}> : () -> ()
    %cst_32 = arith.constant dense<0.000000e+00> : vector<2x8x8xf32>
    %88 = tpu.matmul %87, %72, %cst_32 {dimension_numbers = #tpu.dot_dimension_numbers<[2], [1], [1], [2], [0, 0, 0, 1, 1, 2], [0], [0]>} : vector<2x8x8xf32>, vector<2x8x8xf32>, vector<2x8x8xf32> -> vector<2x8x8xf32>
    "tpu.trace_stop"() : () -> ()
    %89 = vector.extract_strided_slice %31 {offsets = [0, 0, 24], sizes = [2, 8, 8], strides = [1, 1, 1]} : vector<2x8x96xf32> to vector<2x8x8xf32>
    %90 = vector.extract_strided_slice %31 {offsets = [0, 0, 56], sizes = [2, 8, 8], strides = [1, 1, 1]} : vector<2x8x96xf32> to vector<2x8x8xf32>
    %91 = vector.extract_strided_slice %31 {offsets = [0, 0, 88], sizes = [2, 8, 8], strides = [1, 1, 1]} : vector<2x8x96xf32> to vector<2x8x8xf32>
    "tpu.trace_start"() <{level = 10 : i32, message = "bqd,bkd->bqk"}> : () -> ()
    %cst_33 = arith.constant dense<0.000000e+00> : vector<2x8x8xf32>
    %92 = tpu.matmul %89, %90, %cst_33 {dimension_numbers = #tpu.dot_dimension_numbers<[2], [2], [1], [1], [0, 0, 0, 1, 1, 1], [0], [0]>} : vector<2x8x8xf32>, vector<2x8x8xf32>, vector<2x8x8xf32> -> vector<2x8x8xf32>
    "tpu.trace_stop"() : () -> ()
    %93 = vector.broadcast %10 : vector<2x1x8xf32> to vector<2x8x8xf32>
    %94 = arith.addf %92, %93 : vector<2x8x8xf32>
    %cst_34 = arith.constant 0.176776692 : f32
    %95 = vector.broadcast %cst_34 : f32 to vector<2x8x8xf32>
    %96 = arith.mulf %94, %95 : vector<2x8x8xf32>
    %cst_35 = arith.constant dense<0xFF800000> : vector<2x8xf32>
    %97 = vector.multi_reduction <maximumf>, %96, %cst_35 [2] : vector<2x8x8xf32> to vector<2x8xf32>
    %98 = vector.shape_cast %97 : vector<2x8xf32> to vector<2x8x1xf32>
    %99 = vector.broadcast %98 : vector<2x8x1xf32> to vector<2x8x8xf32>
    %100 = arith.subf %96, %99 : vector<2x8x8xf32>
    %101 = math.exp %100 : vector<2x8x8xf32>
    %cst_36 = arith.constant dense<0.000000e+00> : vector<2x8xf32>
    %102 = vector.multi_reduction <add>, %101, %cst_36 [2] : vector<2x8x8xf32> to vector<2x8xf32>
    %103 = vector.shape_cast %102 : vector<2x8xf32> to vector<2x8x1xf32>
    %104 = tpu.reciprocal %103 {approx = true} : vector<2x8x1xf32> -> vector<2x8x1xf32>
    %105 = vector.broadcast %104 : vector<2x8x1xf32> to vector<2x8x8xf32>
    %106 = arith.mulf %101, %105 : vector<2x8x8xf32>
    "tpu.trace_start"() <{level = 10 : i32, message = "bqk,bkd->bqd"}> : () -> ()
    %cst_37 = arith.constant dense<0.000000e+00> : vector<2x8x8xf32>
    %107 = tpu.matmul %106, %91, %cst_37 {dimension_numbers = #tpu.dot_dimension_numbers<[2], [1], [1], [2], [0, 0, 0, 1, 1, 2], [0], [0]>} : vector<2x8x8xf32>, vector<2x8x8xf32>, vector<2x8x8xf32> -> vector<2x8x8xf32>
    "tpu.trace_stop"() : () -> ()
    %108 = tpu.concatenate %50, %69, %88, %107 in 2 : vector<2x8x8xf32>, vector<2x8x8xf32>, vector<2x8x8xf32>, vector<2x8x8xf32> -> vector<2x8x32xf32>
    %109 = vector.shape_cast %108 : vector<2x8x32xf32> to vector<16x32xf32>
    %cst_38 = arith.constant dense<0.000000e+00> : vector<16x32xf32>
    %110 = tpu.matmul %109, %18, %cst_38 {dimension_numbers = #tpu.dot_dimension_numbers<[1], [0], [0], [1], [0, 0, 1, 1], [], []>} : vector<16x32xf32>, vector<32x32xf32>, vector<16x32xf32> -> vector<16x32xf32>
    %111 = vector.broadcast %21 : vector<1x32xf32> to vector<16x32xf32>
    %112 = arith.addf %110, %111 : vector<16x32xf32>
    %113 = arith.addf %112, %9 : vector<16x32xf32>
    %cst_39 = arith.constant dense<0.000000e+00> : vector<16xf32>
    %114 = vector.multi_reduction <add>, %113, %cst_39 [1] : vector<16x32xf32> to vector<16xf32>
    %115 = vector.shape_cast %114 : vector<16xf32> to vector<16x1xf32>
    %cst_40 = arith.constant 3.200000e+01 : f32
    %116 = vector.broadcast %cst_40 : f32 to vector<16x1xf32>
    %117 = arith.divf %115, %116 : vector<16x1xf32>
    %118 = vector.broadcast %117 : vector<16x1xf32> to vector<16x32xf32>
    %119 = arith.subf %113, %118 : vector<16x32xf32>
    %120 = arith.mulf %119, %119 : vector<16x32xf32>
    %cst_41 = arith.constant dense<0.000000e+00> : vector<16xf32>
    %121 = vector.multi_reduction <add>, %120, %cst_41 [1] : vector<16x32xf32> to vector<16xf32>
    %122 = vector.shape_cast %121 : vector<16xf32> to vector<16x1xf32>
    %cst_42 = arith.constant 3.200000e+01 : f32
    %123 = vector.broadcast %cst_42 : f32 to vector<16x1xf32>
    %124 = arith.divf %122, %123 : vector<16x1xf32>
    %125 = vector.broadcast %117 : vector<16x1xf32> to vector<16x32xf32>
    %126 = arith.subf %113, %125 : vector<16x32xf32>
    %cst_43 = arith.constant 9.99999997E-7 : f32
    %127 = vector.broadcast %cst_43 : f32 to vector<16x1xf32>
    %128 = arith.addf %124, %127 : vector<16x1xf32>
    %129 = math.rsqrt %128 : vector<16x1xf32>
    %130 = vector.broadcast %129 : vector<16x1xf32> to vector<16x32xf32>
    %131 = arith.mulf %126, %130 : vector<16x32xf32>
    %132 = vector.broadcast %24 : vector<1x32xf32> to vector<16x32xf32>
    %133 = arith.mulf %131, %132 : vector<16x32xf32>
    %134 = vector.broadcast %25 : vector<1x32xf32> to vector<16x32xf32>
    %135 = arith.addf %133, %134 : vector<16x32xf32>
    %cst_44 = arith.constant dense<0.000000e+00> : vector<16x64xf32>
    %136 = tpu.matmul %135, %19, %cst_44 {dimension_numbers = #tpu.dot_dimension_numbers<[1], [0], [0], [1], [0, 0, 1, 1], [], []>} : vector<16x32xf32>, vector<32x64xf32>, vector<16x64xf32> -> vector<16x64xf32>
    %137 = vector.broadcast %22 : vector<1x64xf32> to vector<16x64xf32>
    %138 = arith.addf %136, %137 : vector<16x64xf32>
    %cst_45 = arith.constant 0.000000e+00 : f32
    %139 = vector.broadcast %cst_45 : f32 to vector<16x64xf32>
    %140 = arith.maximumf %138, %139 : vector<16x64xf32>
    %cst_46 = arith.constant dense<0.000000e+00> : vector<16x32xf32>
    %141 = tpu.matmul %140, %14, %cst_46 {dimension_numbers = #tpu.dot_dimension_numbers<[1], [0], [0], [1], [0, 0, 1, 1], [], []>} : vector<16x64xf32>, vector<64x32xf32>, vector<16x32xf32> -> vector<16x32xf32>
    %142 = vector.broadcast %23 : vector<1x32xf32> to vector<16x32xf32>
    %143 = arith.addf %141, %142 : vector<16x32xf32>
    %144 = arith.addf %143, %135 : vector<16x32xf32>
    %cst_47 = arith.constant dense<0.000000e+00> : vector<16xf32>
    %145 = vector.multi_reduction <add>, %144, %cst_47 [1] : vector<16x32xf32> to vector<16xf32>
    %146 = vector.shape_cast %145 : vector<16xf32> to vector<16x1xf32>
    %cst_48 = arith.constant 3.200000e+01 : f32
    %147 = vector.broadcast %cst_48 : f32 to vector<16x1xf32>
    %148 = arith.divf %146, %147 : vector<16x1xf32>
    %149 = vector.broadcast %148 : vector<16x1xf32> to vector<16x32xf32>
    %150 = arith.subf %144, %149 : vector<16x32xf32>
    %151 = arith.mulf %150, %150 : vector<16x32xf32>
    %cst_49 = arith.constant dense<0.000000e+00> : vector<16xf32>
    %152 = vector.multi_reduction <add>, %151, %cst_49 [1] : vector<16x32xf32> to vector<16xf32>
    %153 = vector.shape_cast %152 : vector<16xf32> to vector<16x1xf32>
    %cst_50 = arith.constant 3.200000e+01 : f32
    %154 = vector.broadcast %cst_50 : f32 to vector<16x1xf32>
    %155 = arith.divf %153, %154 : vector<16x1xf32>
    %156 = vector.broadcast %148 : vector<16x1xf32> to vector<16x32xf32>
    %157 = arith.subf %144, %156 : vector<16x32xf32>
    %cst_51 = arith.constant 9.99999997E-7 : f32
    %158 = vector.broadcast %cst_51 : f32 to vector<16x1xf32>
    %159 = arith.addf %155, %158 : vector<16x1xf32>
    %160 = math.rsqrt %159 : vector<16x1xf32>
    %161 = vector.broadcast %160 : vector<16x1xf32> to vector<16x32xf32>
    %162 = arith.mulf %157, %161 : vector<16x32xf32>
    %163 = vector.broadcast %26 : vector<1x32xf32> to vector<16x32xf32>
    %164 = arith.mulf %162, %163 : vector<16x32xf32>
    %165 = vector.broadcast %27 : vector<1x32xf32> to vector<16x32xf32>
    %166 = arith.addf %164, %165 : vector<16x32xf32>
    %c1 = arith.constant 1 : index
    %c0_52 = arith.constant 0 : index
    %c0_53 = arith.constant 0 : index
    %167 = vector.load %arg4[%c1, %c0_52, %c0_53] : memref<2x32x192xf32, #tpu.memory_space<vmem>>, vector<1x32x192xf32>
    %168 = vector.shape_cast %167 : vector<1x32x192xf32> to vector<32x192xf32>
    %c1_54 = arith.constant 1 : index
    %c0_55 = arith.constant 0 : index
    %c0_56 = arith.constant 0 : index
    %169 = vector.load %arg5[%c1_54, %c0_55, %c0_56] : memref<2x64x32xf32, #tpu.memory_space<vmem>>, vector<1x64x32xf32>
    %170 = vector.shape_cast %169 : vector<1x64x32xf32> to vector<64x32xf32>
    %c1_57 = arith.constant 1 : index
    %c0_58 = arith.constant 0 : index
    %c0_59 = arith.constant 0 : index
    %171 = vector.load %arg6[%c1_57, %c0_58, %c0_59] : memref<2x8x96xf32, #tpu.memory_space<vmem>>, vector<1x8x96xf32>
    %172 = vector.shape_cast %171 : vector<1x8x96xf32> to vector<8x96xf32>
    %173 = vector.extract_strided_slice %168 {offsets = [0, 0], sizes = [32, 96], strides = [1, 1]} : vector<32x192xf32> to vector<32x96xf32>
    %174 = vector.extract_strided_slice %168 {offsets = [0, 96], sizes = [32, 32], strides = [1, 1]} : vector<32x192xf32> to vector<32x32xf32>
    %175 = vector.extract_strided_slice %168 {offsets = [0, 128], sizes = [32, 64], strides = [1, 1]} : vector<32x192xf32> to vector<32x64xf32>
    %176 = vector.extract_strided_slice %172 {offsets = [0, 0], sizes = [1, 96], strides = [1, 1]} : vector<8x96xf32> to vector<1x96xf32>
    %177 = vector.extract_strided_slice %172 {offsets = [1, 0], sizes = [1, 32], strides = [1, 1]} : vector<8x96xf32> to vector<1x32xf32>
    %178 = vector.extract_strided_slice %172 {offsets = [2, 0], sizes = [1, 64], strides = [1, 1]} : vector<8x96xf32> to vector<1x64xf32>
    %179 = vector.extract_strided_slice %172 {offsets = [3, 0], sizes = [1, 32], strides = [1, 1]} : vector<8x96xf32> to vector<1x32xf32>
    %180 = vector.extract_strided_slice %172 {offsets = [4, 0], sizes = [1, 32], strides = [1, 1]} : vector<8x96xf32> to vector<1x32xf32>
    %181 = vector.extract_strided_slice %172 {offsets = [5, 0], sizes = [1, 32], strides = [1, 1]} : vector<8x96xf32> to vector<1x32xf32>
    %182 = vector.extract_strided_slice %172 {offsets = [6, 0], sizes = [1, 32], strides = [1, 1]} : vector<8x96xf32> to vector<1x32xf32>
    %183 = vector.extract_strided_slice %172 {offsets = [7, 0], sizes = [1, 32], strides = [1, 1]} : vector<8x96xf32> to vector<1x32xf32>
    %cst_60 = arith.constant dense<0.000000e+00> : vector<16x96xf32>
    %184 = tpu.matmul %166, %173, %cst_60 {dimension_numbers = #tpu.dot_dimension_numbers<[1], [0], [0], [1], [0, 0, 1, 1], [], []>} : vector<16x32xf32>, vector<32x96xf32>, vector<16x96xf32> -> vector<16x96xf32>
    %185 = vector.broadcast %176 : vector<1x96xf32> to vector<16x96xf32>
    %186 = arith.addf %184, %185 : vector<16x96xf32>
    %187 = vector.shape_cast %186 : vector<16x96xf32> to vector<2x8x96xf32>
    %188 = vector.extract_strided_slice %187 {offsets = [0, 0, 0], sizes = [2, 8, 8], strides = [1, 1, 1]} : vector<2x8x96xf32> to vector<2x8x8xf32>
    %189 = vector.extract_strided_slice %187 {offsets = [0, 0, 32], sizes = [2, 8, 8], strides = [1, 1, 1]} : vector<2x8x96xf32> to vector<2x8x8xf32>
    %190 = vector.extract_strided_slice %187 {offsets = [0, 0, 64], sizes = [2, 8, 8], strides = [1, 1, 1]} : vector<2x8x96xf32> to vector<2x8x8xf32>
    "tpu.trace_start"() <{level = 10 : i32, message = "bqd,bkd->bqk"}> : () -> ()
    %cst_61 = arith.constant dense<0.000000e+00> : vector<2x8x8xf32>
    %191 = tpu.matmul %188, %189, %cst_61 {dimension_numbers = #tpu.dot_dimension_numbers<[2], [2], [1], [1], [0, 0, 0, 1, 1, 1], [0], [0]>} : vector<2x8x8xf32>, vector<2x8x8xf32>, vector<2x8x8xf32> -> vector<2x8x8xf32>
    "tpu.trace_stop"() : () -> ()
    %192 = vector.broadcast %10 : vector<2x1x8xf32> to vector<2x8x8xf32>
    %193 = arith.addf %191, %192 : vector<2x8x8xf32>
    %cst_62 = arith.constant 0.176776692 : f32
    %194 = vector.broadcast %cst_62 : f32 to vector<2x8x8xf32>
    %195 = arith.mulf %193, %194 : vector<2x8x8xf32>
    %cst_63 = arith.constant dense<0xFF800000> : vector<2x8xf32>
    %196 = vector.multi_reduction <maximumf>, %195, %cst_63 [2] : vector<2x8x8xf32> to vector<2x8xf32>
    %197 = vector.shape_cast %196 : vector<2x8xf32> to vector<2x8x1xf32>
    %198 = vector.broadcast %197 : vector<2x8x1xf32> to vector<2x8x8xf32>
    %199 = arith.subf %195, %198 : vector<2x8x8xf32>
    %200 = math.exp %199 : vector<2x8x8xf32>
    %cst_64 = arith.constant dense<0.000000e+00> : vector<2x8xf32>
    %201 = vector.multi_reduction <add>, %200, %cst_64 [2] : vector<2x8x8xf32> to vector<2x8xf32>
    %202 = vector.shape_cast %201 : vector<2x8xf32> to vector<2x8x1xf32>
    %203 = tpu.reciprocal %202 {approx = true} : vector<2x8x1xf32> -> vector<2x8x1xf32>
    %204 = vector.broadcast %203 : vector<2x8x1xf32> to vector<2x8x8xf32>
    %205 = arith.mulf %200, %204 : vector<2x8x8xf32>
    "tpu.trace_start"() <{level = 10 : i32, message = "bqk,bkd->bqd"}> : () -> ()
    %cst_65 = arith.constant dense<0.000000e+00> : vector<2x8x8xf32>
    %206 = tpu.matmul %205, %190, %cst_65 {dimension_numbers = #tpu.dot_dimension_numbers<[2], [1], [1], [2], [0, 0, 0, 1, 1, 2], [0], [0]>} : vector<2x8x8xf32>, vector<2x8x8xf32>, vector<2x8x8xf32> -> vector<2x8x8xf32>
    "tpu.trace_stop"() : () -> ()
    %207 = vector.extract_strided_slice %187 {offsets = [0, 0, 8], sizes = [2, 8, 8], strides = [1, 1, 1]} : vector<2x8x96xf32> to vector<2x8x8xf32>
    %208 = vector.extract_strided_slice %187 {offsets = [0, 0, 40], sizes = [2, 8, 8], strides = [1, 1, 1]} : vector<2x8x96xf32> to vector<2x8x8xf32>
    %209 = vector.extract_strided_slice %187 {offsets = [0, 0, 72], sizes = [2, 8, 8], strides = [1, 1, 1]} : vector<2x8x96xf32> to vector<2x8x8xf32>
    "tpu.trace_start"() <{level = 10 : i32, message = "bqd,bkd->bqk"}> : () -> ()
    %cst_66 = arith.constant dense<0.000000e+00> : vector<2x8x8xf32>
    %210 = tpu.matmul %207, %208, %cst_66 {dimension_numbers = #tpu.dot_dimension_numbers<[2], [2], [1], [1], [0, 0, 0, 1, 1, 1], [0], [0]>} : vector<2x8x8xf32>, vector<2x8x8xf32>, vector<2x8x8xf32> -> vector<2x8x8xf32>
    "tpu.trace_stop"() : () -> ()
    %211 = vector.broadcast %10 : vector<2x1x8xf32> to vector<2x8x8xf32>
    %212 = arith.addf %210, %211 : vector<2x8x8xf32>
    %cst_67 = arith.constant 0.176776692 : f32
    %213 = vector.broadcast %cst_67 : f32 to vector<2x8x8xf32>
    %214 = arith.mulf %212, %213 : vector<2x8x8xf32>
    %cst_68 = arith.constant dense<0xFF800000> : vector<2x8xf32>
    %215 = vector.multi_reduction <maximumf>, %214, %cst_68 [2] : vector<2x8x8xf32> to vector<2x8xf32>
    %216 = vector.shape_cast %215 : vector<2x8xf32> to vector<2x8x1xf32>
    %217 = vector.broadcast %216 : vector<2x8x1xf32> to vector<2x8x8xf32>
    %218 = arith.subf %214, %217 : vector<2x8x8xf32>
    %219 = math.exp %218 : vector<2x8x8xf32>
    %cst_69 = arith.constant dense<0.000000e+00> : vector<2x8xf32>
    %220 = vector.multi_reduction <add>, %219, %cst_69 [2] : vector<2x8x8xf32> to vector<2x8xf32>
    %221 = vector.shape_cast %220 : vector<2x8xf32> to vector<2x8x1xf32>
    %222 = tpu.reciprocal %221 {approx = true} : vector<2x8x1xf32> -> vector<2x8x1xf32>
    %223 = vector.broadcast %222 : vector<2x8x1xf32> to vector<2x8x8xf32>
    %224 = arith.mulf %219, %223 : vector<2x8x8xf32>
    "tpu.trace_start"() <{level = 10 : i32, message = "bqk,bkd->bqd"}> : () -> ()
    %cst_70 = arith.constant dense<0.000000e+00> : vector<2x8x8xf32>
    %225 = tpu.matmul %224, %209, %cst_70 {dimension_numbers = #tpu.dot_dimension_numbers<[2], [1], [1], [2], [0, 0, 0, 1, 1, 2], [0], [0]>} : vector<2x8x8xf32>, vector<2x8x8xf32>, vector<2x8x8xf32> -> vector<2x8x8xf32>
    "tpu.trace_stop"() : () -> ()
    %226 = vector.extract_strided_slice %187 {offsets = [0, 0, 16], sizes = [2, 8, 8], strides = [1, 1, 1]} : vector<2x8x96xf32> to vector<2x8x8xf32>
    %227 = vector.extract_strided_slice %187 {offsets = [0, 0, 48], sizes = [2, 8, 8], strides = [1, 1, 1]} : vector<2x8x96xf32> to vector<2x8x8xf32>
    %228 = vector.extract_strided_slice %187 {offsets = [0, 0, 80], sizes = [2, 8, 8], strides = [1, 1, 1]} : vector<2x8x96xf32> to vector<2x8x8xf32>
    "tpu.trace_start"() <{level = 10 : i32, message = "bqd,bkd->bqk"}> : () -> ()
    %cst_71 = arith.constant dense<0.000000e+00> : vector<2x8x8xf32>
    %229 = tpu.matmul %226, %227, %cst_71 {dimension_numbers = #tpu.dot_dimension_numbers<[2], [2], [1], [1], [0, 0, 0, 1, 1, 1], [0], [0]>} : vector<2x8x8xf32>, vector<2x8x8xf32>, vector<2x8x8xf32> -> vector<2x8x8xf32>
    "tpu.trace_stop"() : () -> ()
    %230 = vector.broadcast %10 : vector<2x1x8xf32> to vector<2x8x8xf32>
    %231 = arith.addf %229, %230 : vector<2x8x8xf32>
    %cst_72 = arith.constant 0.176776692 : f32
    %232 = vector.broadcast %cst_72 : f32 to vector<2x8x8xf32>
    %233 = arith.mulf %231, %232 : vector<2x8x8xf32>
    %cst_73 = arith.constant dense<0xFF800000> : vector<2x8xf32>
    %234 = vector.multi_reduction <maximumf>, %233, %cst_73 [2] : vector<2x8x8xf32> to vector<2x8xf32>
    %235 = vector.shape_cast %234 : vector<2x8xf32> to vector<2x8x1xf32>
    %236 = vector.broadcast %235 : vector<2x8x1xf32> to vector<2x8x8xf32>
    %237 = arith.subf %233, %236 : vector<2x8x8xf32>
    %238 = math.exp %237 : vector<2x8x8xf32>
    %cst_74 = arith.constant dense<0.000000e+00> : vector<2x8xf32>
    %239 = vector.multi_reduction <add>, %238, %cst_74 [2] : vector<2x8x8xf32> to vector<2x8xf32>
    %240 = vector.shape_cast %239 : vector<2x8xf32> to vector<2x8x1xf32>
    %241 = tpu.reciprocal %240 {approx = true} : vector<2x8x1xf32> -> vector<2x8x1xf32>
    %242 = vector.broadcast %241 : vector<2x8x1xf32> to vector<2x8x8xf32>
    %243 = arith.mulf %238, %242 : vector<2x8x8xf32>
    "tpu.trace_start"() <{level = 10 : i32, message = "bqk,bkd->bqd"}> : () -> ()
    %cst_75 = arith.constant dense<0.000000e+00> : vector<2x8x8xf32>
    %244 = tpu.matmul %243, %228, %cst_75 {dimension_numbers = #tpu.dot_dimension_numbers<[2], [1], [1], [2], [0, 0, 0, 1, 1, 2], [0], [0]>} : vector<2x8x8xf32>, vector<2x8x8xf32>, vector<2x8x8xf32> -> vector<2x8x8xf32>
    "tpu.trace_stop"() : () -> ()
    %245 = vector.extract_strided_slice %187 {offsets = [0, 0, 24], sizes = [2, 8, 8], strides = [1, 1, 1]} : vector<2x8x96xf32> to vector<2x8x8xf32>
    %246 = vector.extract_strided_slice %187 {offsets = [0, 0, 56], sizes = [2, 8, 8], strides = [1, 1, 1]} : vector<2x8x96xf32> to vector<2x8x8xf32>
    %247 = vector.extract_strided_slice %187 {offsets = [0, 0, 88], sizes = [2, 8, 8], strides = [1, 1, 1]} : vector<2x8x96xf32> to vector<2x8x8xf32>
    "tpu.trace_start"() <{level = 10 : i32, message = "bqd,bkd->bqk"}> : () -> ()
    %cst_76 = arith.constant dense<0.000000e+00> : vector<2x8x8xf32>
    %248 = tpu.matmul %245, %246, %cst_76 {dimension_numbers = #tpu.dot_dimension_numbers<[2], [2], [1], [1], [0, 0, 0, 1, 1, 1], [0], [0]>} : vector<2x8x8xf32>, vector<2x8x8xf32>, vector<2x8x8xf32> -> vector<2x8x8xf32>
    "tpu.trace_stop"() : () -> ()
    %249 = vector.broadcast %10 : vector<2x1x8xf32> to vector<2x8x8xf32>
    %250 = arith.addf %248, %249 : vector<2x8x8xf32>
    %cst_77 = arith.constant 0.176776692 : f32
    %251 = vector.broadcast %cst_77 : f32 to vector<2x8x8xf32>
    %252 = arith.mulf %250, %251 : vector<2x8x8xf32>
    %cst_78 = arith.constant dense<0xFF800000> : vector<2x8xf32>
    %253 = vector.multi_reduction <maximumf>, %252, %cst_78 [2] : vector<2x8x8xf32> to vector<2x8xf32>
    %254 = vector.shape_cast %253 : vector<2x8xf32> to vector<2x8x1xf32>
    %255 = vector.broadcast %254 : vector<2x8x1xf32> to vector<2x8x8xf32>
    %256 = arith.subf %252, %255 : vector<2x8x8xf32>
    %257 = math.exp %256 : vector<2x8x8xf32>
    %cst_79 = arith.constant dense<0.000000e+00> : vector<2x8xf32>
    %258 = vector.multi_reduction <add>, %257, %cst_79 [2] : vector<2x8x8xf32> to vector<2x8xf32>
    %259 = vector.shape_cast %258 : vector<2x8xf32> to vector<2x8x1xf32>
    %260 = tpu.reciprocal %259 {approx = true} : vector<2x8x1xf32> -> vector<2x8x1xf32>
    %261 = vector.broadcast %260 : vector<2x8x1xf32> to vector<2x8x8xf32>
    %262 = arith.mulf %257, %261 : vector<2x8x8xf32>
    "tpu.trace_start"() <{level = 10 : i32, message = "bqk,bkd->bqd"}> : () -> ()
    %cst_80 = arith.constant dense<0.000000e+00> : vector<2x8x8xf32>
    %263 = tpu.matmul %262, %247, %cst_80 {dimension_numbers = #tpu.dot_dimension_numbers<[2], [1], [1], [2], [0, 0, 0, 1, 1, 2], [0], [0]>} : vector<2x8x8xf32>, vector<2x8x8xf32>, vector<2x8x8xf32> -> vector<2x8x8xf32>
    "tpu.trace_stop"() : () -> ()
    %264 = tpu.concatenate %206, %225, %244, %263 in 2 : vector<2x8x8xf32>, vector<2x8x8xf32>, vector<2x8x8xf32>, vector<2x8x8xf32> -> vector<2x8x32xf32>
    %265 = vector.shape_cast %264 : vector<2x8x32xf32> to vector<16x32xf32>
    %cst_81 = arith.constant dense<0.000000e+00> : vector<16x32xf32>
    %266 = tpu.matmul %265, %174, %cst_81 {dimension_numbers = #tpu.dot_dimension_numbers<[1], [0], [0], [1], [0, 0, 1, 1], [], []>} : vector<16x32xf32>, vector<32x32xf32>, vector<16x32xf32> -> vector<16x32xf32>
    %267 = vector.broadcast %177 : vector<1x32xf32> to vector<16x32xf32>
    %268 = arith.addf %266, %267 : vector<16x32xf32>
    %269 = arith.addf %268, %166 : vector<16x32xf32>
    %cst_82 = arith.constant dense<0.000000e+00> : vector<16xf32>
    %270 = vector.multi_reduction <add>, %269, %cst_82 [1] : vector<16x32xf32> to vector<16xf32>
    %271 = vector.shape_cast %270 : vector<16xf32> to vector<16x1xf32>
    %cst_83 = arith.constant 3.200000e+01 : f32
    %272 = vector.broadcast %cst_83 : f32 to vector<16x1xf32>
    %273 = arith.divf %271, %272 : vector<16x1xf32>
    %274 = vector.broadcast %273 : vector<16x1xf32> to vector<16x32xf32>
    %275 = arith.subf %269, %274 : vector<16x32xf32>
    %276 = arith.mulf %275, %275 : vector<16x32xf32>
    %cst_84 = arith.constant dense<0.000000e+00> : vector<16xf32>
    %277 = vector.multi_reduction <add>, %276, %cst_84 [1] : vector<16x32xf32> to vector<16xf32>
    %278 = vector.shape_cast %277 : vector<16xf32> to vector<16x1xf32>
    %cst_85 = arith.constant 3.200000e+01 : f32
    %279 = vector.broadcast %cst_85 : f32 to vector<16x1xf32>
    %280 = arith.divf %278, %279 : vector<16x1xf32>
    %281 = vector.broadcast %273 : vector<16x1xf32> to vector<16x32xf32>
    %282 = arith.subf %269, %281 : vector<16x32xf32>
    %cst_86 = arith.constant 9.99999997E-7 : f32
    %283 = vector.broadcast %cst_86 : f32 to vector<16x1xf32>
    %284 = arith.addf %280, %283 : vector<16x1xf32>
    %285 = math.rsqrt %284 : vector<16x1xf32>
    %286 = vector.broadcast %285 : vector<16x1xf32> to vector<16x32xf32>
    %287 = arith.mulf %282, %286 : vector<16x32xf32>
    %288 = vector.broadcast %180 : vector<1x32xf32> to vector<16x32xf32>
    %289 = arith.mulf %287, %288 : vector<16x32xf32>
    %290 = vector.broadcast %181 : vector<1x32xf32> to vector<16x32xf32>
    %291 = arith.addf %289, %290 : vector<16x32xf32>
    %cst_87 = arith.constant dense<0.000000e+00> : vector<16x64xf32>
    %292 = tpu.matmul %291, %175, %cst_87 {dimension_numbers = #tpu.dot_dimension_numbers<[1], [0], [0], [1], [0, 0, 1, 1], [], []>} : vector<16x32xf32>, vector<32x64xf32>, vector<16x64xf32> -> vector<16x64xf32>
    %293 = vector.broadcast %178 : vector<1x64xf32> to vector<16x64xf32>
    %294 = arith.addf %292, %293 : vector<16x64xf32>
    %cst_88 = arith.constant 0.000000e+00 : f32
    %295 = vector.broadcast %cst_88 : f32 to vector<16x64xf32>
    %296 = arith.maximumf %294, %295 : vector<16x64xf32>
    %cst_89 = arith.constant dense<0.000000e+00> : vector<16x32xf32>
    %297 = tpu.matmul %296, %170, %cst_89 {dimension_numbers = #tpu.dot_dimension_numbers<[1], [0], [0], [1], [0, 0, 1, 1], [], []>} : vector<16x64xf32>, vector<64x32xf32>, vector<16x32xf32> -> vector<16x32xf32>
    %298 = vector.broadcast %179 : vector<1x32xf32> to vector<16x32xf32>
    %299 = arith.addf %297, %298 : vector<16x32xf32>
    %300 = arith.addf %299, %291 : vector<16x32xf32>
    %cst_90 = arith.constant dense<0.000000e+00> : vector<16xf32>
    %301 = vector.multi_reduction <add>, %300, %cst_90 [1] : vector<16x32xf32> to vector<16xf32>
    %302 = vector.shape_cast %301 : vector<16xf32> to vector<16x1xf32>
    %cst_91 = arith.constant 3.200000e+01 : f32
    %303 = vector.broadcast %cst_91 : f32 to vector<16x1xf32>
    %304 = arith.divf %302, %303 : vector<16x1xf32>
    %305 = vector.broadcast %304 : vector<16x1xf32> to vector<16x32xf32>
    %306 = arith.subf %300, %305 : vector<16x32xf32>
    %307 = arith.mulf %306, %306 : vector<16x32xf32>
    %cst_92 = arith.constant dense<0.000000e+00> : vector<16xf32>
    %308 = vector.multi_reduction <add>, %307, %cst_92 [1] : vector<16x32xf32> to vector<16xf32>
    %309 = vector.shape_cast %308 : vector<16xf32> to vector<16x1xf32>
    %cst_93 = arith.constant 3.200000e+01 : f32
    %310 = vector.broadcast %cst_93 : f32 to vector<16x1xf32>
    %311 = arith.divf %309, %310 : vector<16x1xf32>
    %312 = vector.broadcast %304 : vector<16x1xf32> to vector<16x32xf32>
    %313 = arith.subf %300, %312 : vector<16x32xf32>
    %cst_94 = arith.constant 9.99999997E-7 : f32
    %314 = vector.broadcast %cst_94 : f32 to vector<16x1xf32>
    %315 = arith.addf %311, %314 : vector<16x1xf32>
    %316 = math.rsqrt %315 : vector<16x1xf32>
    %317 = vector.broadcast %316 : vector<16x1xf32> to vector<16x32xf32>
    %318 = arith.mulf %313, %317 : vector<16x32xf32>
    %319 = vector.broadcast %182 : vector<1x32xf32> to vector<16x32xf32>
    %320 = arith.mulf %318, %319 : vector<16x32xf32>
    %321 = vector.broadcast %183 : vector<1x32xf32> to vector<16x32xf32>
    %322 = arith.addf %320, %321 : vector<16x32xf32>
    %323 = vector.shape_cast %322 : vector<16x32xf32> to vector<2x8x32xf32>
    %324 = vector.extract_strided_slice %323 {offsets = [0, 0, 0], sizes = [2, 1, 32], strides = [1, 1, 1]} : vector<2x8x32xf32> to vector<2x1x32xf32>
    %325 = vector.shape_cast %324 : vector<2x1x32xf32> to vector<2x32xf32>
    %c0_95 = arith.constant 0 : index
    %c0_96 = arith.constant 0 : index
    %326 = vector.load %arg7[%c0_95, %c0_96] : memref<32x2xf32, #tpu.memory_space<vmem>>, vector<32x2xf32>
    %cst_97 = arith.constant dense<0.000000e+00> : vector<2x2xf32>
    %327 = tpu.matmul %325, %326, %cst_97 {dimension_numbers = #tpu.dot_dimension_numbers<[1], [0], [0], [1], [0, 0, 1, 1], [], []>} : vector<2x32xf32>, vector<32x2xf32>, vector<2x2xf32> -> vector<2x2xf32>
    %c0_98 = arith.constant 0 : index
    %c0_99 = arith.constant 0 : index
    %328 = vector.load %arg8[%c0_98, %c0_99] : memref<1x2xf32, #tpu.memory_space<vmem>>, vector<1x2xf32>
    %329 = vector.broadcast %328 : vector<1x2xf32> to vector<2x2xf32>
    %330 = arith.addf %327, %329 : vector<2x2xf32>
    %c0_100 = arith.constant 0 : index
    %c0_101 = arith.constant 0 : index
    %331 = vector.load %arg9[%c0_100, %c0_101] : memref<2x2xf32, #tpu.memory_space<vmem>>, vector<2x2xf32>
    tpu.vector_store %arg9[%c0_100, %c0_101], %330 {strides = array<i32>} : memref<2x2xf32, #tpu.memory_space<vmem>>, vector<2x2xf32>,
    return
  }
}

</mosaic_0001>

<bundles_post_ra>
// kernel: transformer_encoder_forward.1
= control target key start
LH: loop header
LB: loop body
LE: loop exit
PB: predicated region body
PF: predicated region fallthrough
CT: control target
= control target key end

     0   :  { %vm65_vm0 = vcmask 1041408   ;;  %v2071_v2 = vmov 0   ;;  %s2662_s0 = inlined_call_operand.vmem [shape: s32[16,1], index: 0, kind: input, shape index: {}]   ;;  %s2663_s1 = inlined_call_operand.vmem [shape: f32[2,1,8], index: 1, kind: input, shape index: {}]   ;;  %s2664_s2 = inlined_call_operand.vmem [shape: f32[50,32], index: 2, kind: input, shape index: {}]   ;;  %s2665_s3 = inlined_call_operand.vmem [shape: f32[16,32], index: 3, kind: input, shape index: {}]   ;;  %s2666_s4 = inlined_call_operand.vmem [shape: f32[2,32,192], index: 4, kind: input, shape index: {}]   ;;  %s2667_s5 = inlined_call_operand.vmem [shape: f32[2,64,32], index: 5, kind: input, shape index: {}]   ;;  %s2668_s6 = inlined_call_operand.vmem [shape: f32[2,8,96], index: 6, kind: input, shape index: {}]   ;;  %s2669_s7 = inlined_call_operand.vmem [shape: f32[32,2], index: 7, kind: input, shape index: {}]   ;;  %s2670_s8 = inlined_call_operand.vmem [shape: f32[1,2], index: 8, kind: input, shape index: {}]   ;;  %s2671_s9 = inlined_call_operand.hbm [shape: f32[2,2], index: 9, kind: output, shape index: {}]  }
   0x1   :  { %v33_v0 = vld [vmem:[%s2662_s0] sm:$0xff]  ;;  %v55_v1 = vld [vmem:[%s2664_s2 + $0x30] sm:$0x3]  ;;  %1904 = vset.pattern.permute.xlu0 %v2071_v2  ;;  %v54_v3 = vld [vmem:[%s2664_s2 + $0x28] sm:$0xff] }
   0x2   :  { %1800 = vmatpush.msk.msra.mxu0 %vm65_vm0, %v55_v1  ;;  %38 = vperm.xlu0 %1904, %v33_v0   ;;  %v53_v4 = vld [vmem:[%s2664_s2 + $0x20] sm:$0xff] }
   0x4   :  { %79 = vmatpush.msra.mxu0 %v54_v3 }
   0x5   :  { %14 = vsyncpa [#allocation3], 0  ;;  %v52_v5 = vld [vmem:[%s2664_s2 + $0x18] sm:$0xff]  ;;  %v51_v6 = vld [vmem:[%s2664_s2 + $0x10] sm:$0xff]  ;;  %v35_v13 = vlaneseq  ;;  %vm58_vm1 = vcmask 408576   ;;  %v2072_v16 = vmov 0.0  }
   0x6   :  { %80 = vmatpush.msra.mxu0 %v53_v4  ;;  %v34_v7 = vld [vmem:[%s2662_s0 + $0x8] sm:$0xff]  ;;  %v49_v9 = vld [vmem:[%s2664_s2] sm:$0xff]  ;;  %v2170_v10 = vld [vmem:[%s2666_s4 + $0x30] sm:$0xff]  ;;  %vm112_vm4 = vcmask 261120   ;;  %s2073_s18 = smov 96   ;;  %s2075_s19 = smov 72  }
   0x7   :  { %v50_v8 = vld [vmem:[%s2664_s2 + $0x8] sm:$0xff]  ;;  %v2175_v11 = vld [vmem:[%s2666_s4 + $0x20] sm:$0xff]  ;;  %131 = vmatpush.msra.mxu1 %v2170_v10  ;;  %v36_v14 = vand.u32 127, %v35_v13  ;;  %v2184_v20 = vld [vmem:[%s2666_s4 + $0x10] sm:$0xff]  ;;  %s2076_s20 = smov 80   ;;  %vm151_vm5 = vcmask 64512  }
   0x8   :  { %81 = vmatpush.msra.mxu0 %v52_v5  ;;  %v1925_v12 = vpack.i.bf16 %v2175_v11, %v2170_v10  ;;  %v2190_v21 = vld [vmem:[%s2666_s4] sm:$0xff]  ;;  %v57_v26 = vld [vmem:[%s2665_s3 + $0x8] sm:$0xff]  ;;  %s2077_s25 = smov 64   ;;  %s2078_s26 = smov 88   ;;  %vm701_vm6 = vcmask 130048   ;;  %vm704_vm7 = vcmask 195584  }
   0x9   :  { %132 = vmatpush.msra.mxu1 %v2175_v11  ;;  %v1930_v22 = vpack.i.bf16 %v2190_v21, %v2184_v20  ;;  %v56_v23 = vld [vmem:[%s2665_s3] sm:$0xff]  ;;  %s2074_s3 = smov 120   ;;  %s2080_s27 = smov 104   ;;  %vm845_vm15 = vcmask 523264  }
   0xa   :  { %82 = vmatpush.msra.mxu0 %v51_v6  ;;  %41 = vperm.xlu0 %1904, %v34_v7   ;;  %v2212_v29 = vld [vmem:[%s2668_s6] sm:$0xff]  ;;  %s2081_s28 = smov 56   ;;  %s2082_s29 = smov 48  }
   0xb   :  { %133 = vmatpush.msra.mxu1 %v2184_v20  ;;  %v111_v30 = vperm.slane %v2212_v29, 0  ;;  %v2233_v37 = vld [vmem:[%s2663_s1] ss:$0 sm:$0xff]  ;;  %v2240_v42 = vld [vmem:[%s2663_s1 + $0x1] ss:$0 sm:$0xff]  ;;  %s2079_s1 = smov 112  }
   0xc   :  { %83 = vmatpush.msra.mxu0 %v50_v8  ;;  %s2083_s0 = smov 40   ;;  %s2084_s2 = smov 32  }
   0xd   :  { %134 = vmatpush.msra.mxu1 %v2190_v21  ;;  %s2085_s30 = smov 8   ;;  %s2086_s10 = smov 16  }
   0xe   :  { %84 = vmatpush.msra.mxu0 %v49_v9  ;;  %s2087_s11 = smov 24  }
  0x74   :  { %v39_v15 = vpop.permute.xlu0 %38 }
  0x75   :  { %vm43_vm2 = vcmp.eq.s32.totalorder %v39_v15, %v36_v14 }
  0x76   :  { %v1798_v17 = vsel %vm43_vm2, 1.0, %v2072_v16 }
  0x77   :  { %1801 = vmatmul.msk.f32.vlgmr.msra.gmra.mxu0 %vm58_vm1, %v1798_v17 }
  0x7c   :  { %v42_v18 = vpop.permute.xlu0 %41 }
  0x7d   :  { %vm44_vm3 = vcmp.eq.s32.totalorder %v42_v18, %v36_v14 }
  0x7e   :  { %v1799_v19 = vsel %vm44_vm3, 1.0, %v2072_v16 }
  0x7f   :  { %1802 = vmatmul.msk.f32.gmra.mxu0 %vm58_vm1, %v1799_v19 }
  0xf4   :  { %v86_v24 = vpop.f32.mrf.mxu0 }
  0xf5   :  { %v2198_v25 = vadd.f32 %v86_v24, %v56_v23 }
  0xf7   :  { %1803 = vmatmul.msk.f32.vlgmr.msra.gmra.mxu1 %vm112_vm4, %v2198_v25 }
  0xfc   :  { %v89_v27 = vpop.f32.mrf.mxu0 }
  0xfd   :  { %v2205_v28 = vadd.f32 %v89_v27, %v57_v26 }
  0xff   :  { %1804 = vmatmul.msk.f32.gmra.mxu1 %vm112_vm4, %v2205_v28 }
 0x174   :  { %v136_v31 = vpop.f32.mrf.mxu1 }
 0x175   :  { %v2215_v32 = vadd.f32 %v136_v31, %v111_v30 }
 0x177   :  { %149 = vrot.lane.b32.xlu1 %v2215_v32, %s2073_s18 }
 0x17c   :  { %v139_v33 = vpop.f32.mrf.mxu1 }
 0x17d   :  { %v140_v34 = vadd.f32 %v139_v33, %v111_v30 }
 0x17f   :  { %307 = vrot.lane.b32.xlu0 %v140_v34, %s2074_s3  ;;  %177 = vrot.lane.b32.xlu1 %v140_v34, %s2073_s18  ;;  %v2245_v47 = vpack.i.bf16 %v140_v34, %v2215_v32 }
 0x187   :  { %545 = vrot.lane.b32.xlu0 %v2215_v32, %s2075_s19  ;;  %413 = vrot.lane.b32.xlu1 %v2215_v32, %s2076_s20 }
 0x1e9   :  { %v150_v35 = vpop.permute.xlu1 %149 }
 0x1ea   :  { %1805 = vmatpush.xpose.msk.msra.mxu3 %vm151_vm5, %v150_v35 }
 0x1ed   :  { %1806 = vmatmul.msk.f32.vlgmr.msra.gmra.mxu3 %vm151_vm5, %v2215_v32 }
 0x1f1   :  { %v178_v36 = vpop.permute.xlu1 %177  ;;  %v308_v3 = vpop.permute.xlu0 %307 }
 0x1f2   :  { %1807 = vmatpush.xpose.msk.msrb.mxu3 %vm151_vm5, %v178_v36 }
 0x1f5   :  { %1808 = vmatmul.msk.f32.vlgmr.msrb.gmra.mxu3 %vm151_vm5, %v140_v34 }
 0x1f9   :  { %v546_v4 = vpop.permute.xlu0 %545  ;;  %v414_v5 = vpop.permute.xlu1 %413 }
 0x270   :  { %v173_v38 = vpop.f32.mrf.mxu3 }
 0x271   :  { %v174_v39 = vadd.f32 %v2233_v37, %v173_v38 }
 0x273   :  { %v203_v40 = vmul.f32 0.17677669, %v174_v39 }
 0x275   :  { %v205_v41 = vsel %vm151_vm5, %v203_v40, -inf }
 0x276   :  { %206 = vmax.xlane.f32.xlu2 %v205_v41 }
 0x278   :  { %v200_v43 = vpop.f32.mrf.mxu3 }
 0x279   :  { %v201_v44 = vadd.f32 %v2240_v42, %v200_v43 }
 0x27b   :  { %v204_v45 = vmul.f32 0.17677669, %v201_v44 }
 0x27d   :  { %v208_v46 = vsel %vm151_vm5, %v204_v45, -inf }
 0x27e   :  { %209 = vmax.xlane.f32.xlu2 %v208_v46 }
 0x296   :  { %1906 = vrot.lane.b32.xlu2 %v2245_v47, %s2077_s25 }
 0x29e   :  { %281 = vrot.lane.b32.xlu2 %v2215_v32, %s2078_s26 }
 0x2a6   :  { %309 = vrot.lane.b32.xlu2 %v140_v34, %s2078_s26 }
 0x2ae   :  { %279 = vrot.lane.b32.xlu2 %v2215_v32, %s2074_s3 }
 0x2b6   :  { %411 = vrot.lane.b32.xlu2 %v2215_v32, %s2079_s1 }
 0x2be   :  { %441 = vrot.lane.b32.xlu2 %v140_v34, %s2076_s20 }
 0x2c6   :  { %439 = vrot.lane.b32.xlu2 %v140_v34, %s2079_s1 }
 0x2ce   :  { %571 = vrot.lane.b32.xlu2 %v140_v34, %s2080_s27 }
 0x2e9   :  { %v207_v48 = vpop.xlane.xlu2 %206 }
 0x2ea   :  { %v211_v49 = vsub.f32 %v203_v40, %v207_v48 }
 0x2ec   :  { %v213_v50 = vmul.f32 1.442695, %v211_v49 }
 0x2ee   :  { %1963 = vpow2.f32 %v213_v50 }
 0x2f1   :  { %v210_v51 = vpop.xlane.xlu2 %209 }
 0x2f2   :  { %v212_v52 = vsub.f32 %v204_v45, %v210_v51 }
 0x2f4   :  { %v1964_v53 = vpop.eup %1963  ;;  %v215_v54 = vmul.f32 1.442695, %v212_v52 }
 0x2f5   :  { %v217_v55 = vsel %vm151_vm5, %v1964_v53, 0.0 }
 0x2f6   :  { %1965 = vpow2.f32 %v215_v54  ;;  %218 = vadd.xlane.f32.xlu0 %v217_v55 }
 0x2f9   :  { %v1907_v56 = vpop.permute.xlu2 %1906 }
 0x2fa   :  { %v1909_v57 = vunpack.i.h.bf16 %v1907_v56  ;;  %v1908_v58 = vunpack.i.l.bf16 %v1907_v56 }
 0x2fc   :  { %v1966_v59 = vpop.eup %1965  ;;  %248 = vmatpush.msra.mxu2 %v1908_v58  ;;  %274 = vmatpush.msra.mxu3 %v1909_v57 }
 0x2fd   :  { %v220_v60 = vsel %vm151_vm5, %v1966_v59, 0.0 }
 0x2fe   :  { %221 = vadd.xlane.f32.xlu1 %v220_v60 }
 0x301   :  { %v282_v61 = vpop.permute.xlu2 %281 }
 0x302   :  { %1811 = vmatpush.xpose.msk.msrb.mxu2 %vm151_vm5, %v282_v61 }
 0x309   :  { %v310_v62 = vpop.permute.xlu2 %309 }
 0x30a   :  { %573 = vrot.lane.b32.xlu0 %v140_v34, %s2075_s19  ;;  %1813 = vmatpush.xpose.msk.msrb.mxu3 %vm151_vm5, %v310_v62 }
 0x311   :  { %v280_v63 = vpop.permute.xlu2 %279 }
 0x317   :  { %543 = vrot.lane.b32.xlu1 %v2215_v32, %s2080_s27 }
 0x319   :  { %v412_v0 = vpop.permute.xlu2 %411 }
 0x321   :  { %v442_v1 = vpop.permute.xlu2 %441 }
 0x322   :  { %1819 = vmatpush.xpose.msk.msrb.mxu0 %vm151_vm5, %v442_v1 }
 0x329   :  { %v440_v2 = vpop.permute.xlu2 %439 }
 0x32a   :  { %1820 = vmatmul.msk.f32.vlgmr.msrb.gmra.mxu0 %vm151_vm5, %v440_v2 }
 0x331   :  { %v572_v16 = vpop.permute.xlu2 %571 }
 0x369   :  { %v219_v6 = vpop.xlane.xlu0 %218 }
 0x36a   :  { %1967 = vrcp.f32 %v219_v6 }
 0x370   :  { %v1968_v7 = vpop.eup %1967 }
 0x371   :  { %v222_v8 = vpop.xlane.xlu1 %221  ;;  %v225_v9 = vmul.f32 %v1968_v7, %v1964_v53 }
 0x372   :  { %1969 = vrcp.f32 %v222_v8 }
 0x373   :  { %1809 = vmatmul.msk.f32.vlgmr.msra.gmra.mxu2 %vm151_vm5, %v225_v9 }
 0x378   :  { %v1970_v13 = vpop.eup %1969 }
 0x379   :  { %v226_v14 = vmul.f32 %v1970_v13, %v1966_v59 }
 0x37b   :  { %1810 = vmatmul.msk.f32.vlgmr.msra.gmra.mxu3 %vm151_vm5, %v226_v14  ;;  %1812 = vmatmul.msk.f32.vlgmr.msrb.gmra.mxu2 %vm151_vm5, %v280_v63 }
 0x37c   :  { %1817 = vmatpush.xpose.msk.msra.mxu3 %vm151_vm5, %v414_v5  ;;  %v574_v15 = vpop.permute.xlu0 %573 }
 0x37d   :  { %1825 = vmatpush.xpose.msk.msra.mxu0 %vm151_vm5, %v574_v15 }
 0x380   :  { %1826 = vmatmul.msk.f32.vlgmr.msra.gmra.mxu0 %vm151_vm5, %v572_v16 }
 0x383   :  { %1814 = vmatmul.msk.f32.vlgmr.msrb.gmra.mxu3 %vm151_vm5, %v308_v3 }
 0x384   :  { %1823 = vmatpush.xpose.msk.msrb.mxu3 %vm151_vm5, %v546_v4 }
 0x389   :  { %v544_v17 = vpop.permute.xlu1 %543 }
 0x38b   :  { %1818 = vmatmul.msk.f32.vlgmr.msra.gmra.mxu3 %vm151_vm5, %v412_v0 }
 0x393   :  { %1824 = vmatmul.msk.f32.vlgmr.msrb.gmra.mxu3 %vm151_vm5, %v544_v17 }
 0x3a7   :  { %v464_v26 = vpop.f32.mrf.mxu0 }
 0x3a8   :  { %v465_v30 = vadd.f32 %v2240_v42, %v464_v26 }
 0x3aa   :  { %v468_v33 = vmul.f32 0.17677669, %v465_v30 }
 0x3ac   :  { %v472_v36 = vsel %vm151_vm5, %v468_v33, -inf }
 0x3f6   :  { %v2278_v18 = vpop.f32.mrf.mxu2 }
 0x3fd   :  { %v596_v41 = vpop.f32.mrf.mxu0 }
 0x3fe   :  { %v2280_v19 = vpop.f32.mrf.mxu3  ;;  %v304_v23 = vpop.f32.mrf.mxu2  ;;  %v597_v44 = vadd.f32 %v2240_v42, %v596_v41 }
 0x3ff   :  { %v305_v24 = vadd.f32 %v2233_v37, %v304_v23 }
 0x400   :  { %v600_v48 = vmul.f32 0.17677669, %v597_v44 }
 0x401   :  { %v335_v27 = vmul.f32 0.17677669, %v305_v24 }
 0x402   :  { %v604_v51 = vsel %vm151_vm5, %v600_v48, -inf }
 0x403   :  { %v337_v31 = vsel %vm151_vm5, %v335_v27, -inf }
 0x404   :  { %338 = vmax.xlane.f32.xlu1 %v337_v31 }
 0x406   :  { %v332_v32 = vpop.f32.mrf.mxu3 }
 0x407   :  { %v333_v34 = vadd.f32 %v2240_v42, %v332_v32 }
 0x409   :  { %v336_v35 = vmul.f32 0.17677669, %v333_v34 }
 0x40b   :  { %v340_v38 = vsel %vm151_vm5, %v336_v35, -inf }
 0x40c   :  { %473 = vmax.xlane.f32.xlu1 %v472_v36  ;;  %341 = vmax.xlane.f32.xlu0 %v340_v38 }
 0x40e   :  { %v436_v39 = vpop.f32.mrf.mxu3 }
 0x40f   :  { %v437_v40 = vadd.f32 %v2233_v37, %v436_v39 }
 0x411   :  { %v467_v43 = vmul.f32 0.17677669, %v437_v40 }
 0x413   :  { %v469_v45 = vsel %vm151_vm5, %v467_v43, -inf }
 0x414   :  { %470 = vmax.xlane.f32.xlu2 %v469_v45 }
 0x416   :  { %v568_v46 = vpop.f32.mrf.mxu3 }
 0x417   :  { %v569_v49 = vadd.f32 %v2233_v37, %v568_v46 }
 0x419   :  { %v599_v50 = vmul.f32 0.17677669, %v569_v49 }
 0x41b   :  { %v601_v52 = vsel %vm151_vm5, %v599_v50, -inf }
 0x41c   :  { %605 = vmax.xlane.f32.xlu2 %v604_v51  ;;  %602 = vmax.xlane.f32.xlu0 %v601_v52 }
 0x477   :  { %v339_v53 = vpop.xlane.xlu1 %338 }
 0x478   :  { %v343_v54 = vsub.f32 %v335_v27, %v339_v53 }
 0x47a   :  { %v345_v55 = vmul.f32 1.442695, %v343_v54 }
 0x47c   :  { %1971 = vpow2.f32 %v345_v55 }
 0x47f   :  { %v474_v56 = vpop.xlane.xlu1 %473  ;;  %v342_v57 = vpop.xlane.xlu0 %341 }
 0x480   :  { %v476_v58 = vsub.f32 %v468_v33, %v474_v56  ;;  %v344_v61 = vsub.f32 %v336_v35, %v342_v57 }
 0x482   :  { %v1972_v59 = vpop.eup %1971  ;;  %v479_v60 = vmul.f32 1.442695, %v476_v58  ;;  %v347_v63 = vmul.f32 1.442695, %v344_v61 }
 0x483   :  { %v349_v62 = vsel %vm151_vm5, %v1972_v59, 0.0 }
 0x484   :  { %350 = vadd.xlane.f32.xlu1 %v349_v62  ;;  %1973 = vpow2.f32 %v479_v60 }
 0x485   :  { %1975 = vpow2.f32 %v347_v63 }
 0x487   :  { %v471_v0 = vpop.xlane.xlu2 %470 }
 0x488   :  { %v475_v6 = vsub.f32 %v467_v43, %v471_v0 }
 0x48a   :  { %v1974_v1 = vpop.eup %1973  ;;  %v477_v9 = vmul.f32 1.442695, %v475_v6 }
 0x48b   :  { %v484_v2 = vsel %vm151_vm5, %v1974_v1, 0.0  ;;  %v1976_v5 = vpop.eup %1975 }
 0x48c   :  { %485 = vadd.xlane.f32.xlu0 %v484_v2  ;;  %v352_v8 = vsel %vm151_vm5, %v1976_v5, 0.0 }
 0x48f   :  { %v606_v3 = vpop.xlane.xlu2 %605  ;;  %v603_v13 = vpop.xlane.xlu0 %602 }
 0x490   :  { %v608_v4 = vsub.f32 %v600_v48, %v606_v3  ;;  %v607_v15 = vsub.f32 %v599_v50, %v603_v13 }
 0x492   :  { %v611_v7 = vmul.f32 1.442695, %v608_v4  ;;  %v609_v17 = vmul.f32 1.442695, %v607_v15 }
 0x494   :  { %1977 = vpow2.f32 %v611_v7  ;;  %353 = vadd.xlane.f32.xlu0 %v352_v8 }
 0x495   :  { %1979 = vpow2.f32 %v477_v9 }
 0x496   :  { %1981 = vpow2.f32 %v609_v17 }
 0x49a   :  { %v1978_v14 = vpop.eup %1977 }
 0x49b   :  { %v616_v16 = vsel %vm151_vm5, %v1978_v14, 0.0  ;;  %v1980_v23 = vpop.eup %1979 }
 0x49c   :  { %617 = vadd.xlane.f32.xlu2 %v616_v16  ;;  %v481_v24 = vsel %vm151_vm5, %v1980_v23, 0.0  ;;  %v1982_v26 = vpop.eup %1981 }
 0x49d   :  { %1911 = vrot.lane.b32.xlu1 %v2245_v47, %s2081_s28  ;;  %v613_v27 = vsel %vm151_vm5, %v1982_v26, 0.0 }
 0x4a4   :  { %482 = vadd.xlane.f32.xlu2 %v481_v24 }
 0x4a5   :  { %1926 = vrot.lane.b32.xlu1 %v1925_v12, %s2084_s2 }
 0x4a8   :  { %1916 = vrot.lane.b32.xlu0 %v2245_v47, %s2082_s29 }
 0x4ac   :  { %614 = vadd.xlane.f32.xlu2 %v613_v27 }
 0x4ad   :  { %1931 = vrot.lane.b32.xlu1 %v1930_v22, %s2084_s2 }
 0x4c4   :  { %1921 = vrot.lane.b32.xlu2 %v2245_v47, %s2083_s0 }
 0x4f7   :  { %v351_v31 = vpop.xlane.xlu1 %350 }
 0x4f8   :  { %1983 = vrcp.f32 %v351_v31  ;;  %v2088_v31 = vmov 32.0  }
 0x4fe   :  { %v1984_v33 = vpop.eup %1983 }
 0x4ff   :  { %v486_v30 = vpop.xlane.xlu0 %485  ;;  %v357_v41 = vmul.f32 %v1984_v33, %v1972_v59 }
 0x507   :  { %v354_v32 = vpop.xlane.xlu0 %353 }
 0x508   :  { %1985 = vrcp.f32 %v354_v32 }
 0x509   :  { %1987 = vrcp.f32 %v486_v30 }
 0x50e   :  { %v1986_v34 = vpop.eup %1985 }
 0x50f   :  { %v618_v35 = vpop.xlane.xlu2 %617  ;;  %v1912_v36 = vpop.permute.xlu1 %1911  ;;  %v358_v40 = vmul.f32 %v1986_v34, %v1976_v5 }
 0x510   :  { %v1914_v38 = vunpack.i.h.bf16 %v1912_v36  ;;  %v1913_v39 = vunpack.i.l.bf16 %v1912_v36  ;;  %v1988_v43 = vpop.eup %1987 }
 0x511   :  { %v490_v48 = vmul.f32 %v1988_v43, %v1974_v1 }
 0x512   :  { %380 = vmatpush.msrb.mxu1 %v1913_v39  ;;  %406 = vmatpush.msra.mxu2 %v1914_v38 }
 0x513   :  { %1815 = vmatmul.msk.f32.vlgmr.msrb.gmra.mxu1 %vm151_vm5, %v357_v41  ;;  %1816 = vmatmul.msk.f32.vlgmr.msra.gmra.mxu2 %vm151_vm5, %v358_v40 }
 0x517   :  { %v483_v47 = vpop.xlane.xlu2 %482  ;;  %v1927_v59 = vpop.permute.xlu1 %1926 }
 0x518   :  { %1989 = vrcp.f32 %v483_v47  ;;  %v1929_v60 = vunpack.i.h.bf16 %v1927_v59  ;;  %v1928_v61 = vunpack.i.l.bf16 %v1927_v59 }
 0x519   :  { %1991 = vrcp.f32 %v618_v35 }
 0x51a   :  { %v1917_v44 = vpop.permute.xlu0 %1916  ;;  %742 = vmatpush.msra.mxu3 %v1928_v61 }
 0x51b   :  { %v1919_v45 = vunpack.i.h.bf16 %v1917_v44  ;;  %v1918_v46 = vunpack.i.l.bf16 %v1917_v44 }
 0x51c   :  { %743 = vmatpush.msra.mxu3 %v1929_v60 }
 0x51d   :  { %512 = vmatpush.msra.mxu1 %v1918_v46  ;;  %538 = vmatpush.msrb.mxu2 %v1919_v45 }
 0x51e   :  { %v1990_v49 = vpop.eup %1989  ;;  %1822 = vmatmul.msk.f32.vlgmr.msrb.gmra.mxu2 %vm151_vm5, %v490_v48  ;;  %v101_v48 = vld [vmem:[%s2666_s4 + $0x38] sm:$0xff] }
 0x51f   :  { %v489_v50 = vmul.f32 %v1990_v49, %v1980_v23  ;;  %v615_v51 = vpop.xlane.xlu2 %614  ;;  %v1992_v10 = vpop.eup %1991  ;;  %831 = vmatpush.msrb.mxu0 %v101_v48  ;;  %v99_v49 = vld [vmem:[%s2666_s4 + $0x28] sm:$0xff] }
 0x520   :  { %1993 = vrcp.f32 %v615_v51  ;;  %v622_v54 = vmul.f32 %v1992_v10, %v1978_v14  ;;  %v1932_v62 = vpop.permute.xlu1 %1931  ;;  %v95_v51 = vld [vmem:[%s2666_s4 + $0x8] sm:$0xff] }
 0x521   :  { %1821 = vmatmul.msk.f32.vlgmr.msra.gmra.mxu1 %vm151_vm5, %v489_v50  ;;  %v1934_v63 = vunpack.i.h.bf16 %v1932_v62  ;;  %v1933_v0 = vunpack.i.l.bf16 %v1932_v62  ;;  %1995 = vrcp.f32 %v2088_v31  ;;  %832 = vmatpush.msrb.mxu0 %v99_v49  ;;  %v97_v50 = vld [vmem:[%s2666_s4 + $0x18] sm:$0xff] }
 0x523   :  { %744 = vmatpush.msra.mxu3 %v1933_v0  ;;  %833 = vmatpush.msrb.mxu0 %v97_v50 }
 0x525   :  { %745 = vmatpush.msra.mxu3 %v1934_v63  ;;  %834 = vmatpush.msrb.mxu0 %v95_v51 }
 0x526   :  { %v1994_v11 = vpop.eup %1993 }
 0x527   :  { %v1922_v12 = vpop.permute.xlu2 %1921  ;;  %v621_v55 = vmul.f32 %v1994_v11, %v1982_v26  ;;  %v1996_v32 = vpop.eup %1995 }
 0x528   :  { %v1924_v52 = vunpack.i.h.bf16 %v1922_v12  ;;  %v1923_v53 = vunpack.i.l.bf16 %v1922_v12  ;;  %v762_v33 = vmul.f32 32.0, %v1996_v32  ;;  %vm766_vm8 = vweird.f32 %v1996_v32 }
 0x52a   :  { %644 = vmatpush.msrb.mxu1 %v1923_v53  ;;  %670 = vmatpush.msra.mxu2 %v1924_v52  ;;  %v763_v34 = vsub.f32 1.0, %v762_v33  ;;  %v109_v52 = vld [vmem:[%s2667_s5 + $0x38] sm:$0xff]  ;;  %v108_v53 = vld [vmem:[%s2667_s5 + $0x30] sm:$0xff] }
 0x52b   :  { %1827 = vmatmul.msk.f32.vlgmr.msrb.gmra.mxu1 %vm151_vm5, %v621_v55  ;;  %1828 = vmatmul.msk.f32.vlgmr.msra.gmra.mxu2 %vm151_vm5, %v622_v54  ;;  %v107_v54 = vld [vmem:[%s2667_s5 + $0x28] sm:$0xff] }
 0x52c   :  { %v764_v35 = vmul.f32 %v1996_v32, %v763_v34  ;;  %860 = vmatpush.msra.mxu1 %v109_v52  ;;  %v844_v34 = vperm.slane %v2212_v29, 3  ;;  %v2408_v52 = vld [vmem:[%s2666_s4 + $0x60] sm:$0xff] }
 0x52e   :  { %v765_v36 = vadd.f32 %v1996_v32, %v764_v35  ;;  %861 = vmatpush.msra.mxu1 %v108_v53  ;;  %v2414_v53 = vld [vmem:[%s2666_s4 + $0x50] sm:$0xff] }
 0x530   :  { %v2341_v38 = vsel %vm766_vm8, %v1996_v32, %v765_v36  ;;  %862 = vmatpush.msra.mxu1 %v107_v54  ;;  %v2420_v54 = vld [vmem:[%s2666_s4 + $0x40] sm:$0xff] }
 0x590   :  { %v382_v56 = vpop.f32.mrf.mxu1 }
 0x591   :  { %677 = vrot.lane.b32.xlu0 %v382_v56, %s2085_s30 }
 0x596   :  { %v408_v20 = vpop.f32.mrf.mxu2 }
 0x597   :  { %679 = vrot.lane.b32.xlu2 %v408_v20, %s2085_s30  ;;  %v106_v20 = vld [vmem:[%s2667_s5 + $0x20] sm:$0xff] }
 0x598   :  { %863 = vmatpush.msra.mxu1 %v106_v20 }
 0x59e   :  { %v514_v21 = vpop.f32.mrf.mxu1 }
 0x59f   :  { %685 = vrot.lane.b32.xlu0 %v514_v21, %s2086_s10 }
 0x5a1   :  { %v540_v22 = vpop.f32.mrf.mxu2 }
 0x5a7   :  { %687 = vrot.lane.b32.xlu0 %v540_v22, %s2086_s10 }
 0x5a8   :  { %v646_v57 = vpop.f32.mrf.mxu1 }
 0x5a9   :  { %693 = vrot.lane.b32.xlu1 %v646_v57, %s2087_s11  ;;  %v105_v57 = vld [vmem:[%s2667_s5 + $0x18] sm:$0xff] }
 0x5aa   :  { %864 = vmatpush.msra.mxu1 %v105_v57 }
 0x5ae   :  { %v672_v58 = vpop.f32.mrf.mxu2 }
 0x5b1   :  { %695 = vrot.lane.b32.xlu1 %v672_v58, %s2087_s11 }
 0x5f1   :  { %v680_v7 = vpop.permute.xlu2 %679 }
 0x5f2   :  { %v700_v9 = vsel %vm151_vm5, %v2280_v19, %v680_v7 }
 0x603   :  { %v678_v1 = vpop.permute.xlu0 %677 }
 0x604   :  { %v699_v3 = vsel %vm151_vm5, %v2278_v18, %v678_v1  ;;  %v707_v18 = vperm.slane %v2212_v29, 1  ;;  %v806_v1 = vperm.slane %v2212_v29, 4 }
 0x611   :  { %v686_v2 = vpop.permute.xlu0 %685 }
 0x612   :  { %v702_v4 = vsel %vm701_vm6, %v699_v3, %v686_v2 }
 0x619   :  { %v688_v8 = vpop.permute.xlu0 %687 }
 0x61a   :  { %v703_v13 = vsel %vm701_vm6, %v700_v9, %v688_v8 }
 0x61b   :  { %v694_v5 = vpop.permute.xlu1 %693 }
 0x61c   :  { %v705_v6 = vsel %vm704_vm7, %v702_v4, %v694_v5  ;;  %v809_v5 = vperm.slane %v2212_v29, 5 }
 0x61d   :  { %1829 = vmatmul.msk.f32.vlgmr.msra.gmra.mxu3 %vm112_vm4, %v705_v6 }
 0x623   :  { %v696_v14 = vpop.permute.xlu1 %695 }
 0x624   :  { %v706_v15 = vsel %vm704_vm7, %v703_v13, %v696_v14 }
 0x625   :  { %1830 = vmatmul.msk.f32.gmra.mxu3 %vm112_vm4, %v706_v15 }
 0x6a0   :  { %v747_v16 = vpop.f32.mrf.mxu3 }
 0x6a1   :  { %v748_v17 = vadd.f32 %v747_v16, %v707_v18 }
 0x6a3   :  { %v753_v23 = vadd.f32 %v748_v17, %v2198_v25  ;;  %v104_v17 = vld [vmem:[%s2667_s5 + $0x10] sm:$0xff] }
 0x6a4   :  { %865 = vmatpush.msra.mxu1 %v104_v17 }
 0x6a5   :  { %v755_v24 = vsel %vm112_vm4, %v753_v23, 0.0 }
 0x6a6   :  { %756 = vadd.xlane.f32.xlu2 %v755_v24  ;;  %v102_v24 = vld [vmem:[%s2667_s5] sm:$0xff] }
 0x6a8   :  { %v750_v26 = vpop.f32.mrf.mxu3 }
 0x6a9   :  { %v751_v27 = vadd.f32 %v750_v26, %v707_v18  ;;  %v812_v26 = vperm.slane %v2212_v29, 2 }
 0x6ab   :  { %v754_v19 = vadd.f32 %v751_v27, %v2205_v28 }
 0x6ad   :  { %v758_v30 = vsel %vm112_vm4, %v754_v19, 0.0 }
 0x6ae   :  { %759 = vadd.xlane.f32.xlu0 %v758_v30 }
 0x719   :  { %v757_v25 = vpop.xlane.xlu2 %756 }
 0x71a   :  { %v768_v39 = vmul.f32 %v2341_v38, %v757_v25 }
 0x71c   :  { %v770_v40 = vsub.f32 %v753_v23, %v768_v39  ;;  %v103_v23 = vld [vmem:[%s2667_s5 + $0x8] sm:$0xff] }
 0x71d   :  { %866 = vmatpush.msra.mxu1 %v103_v23 }
 0x71e   :  { %v772_v41 = vmul.f32 %v770_v40, %v770_v40 }
 0x71f   :  { %867 = vmatpush.msra.mxu1 %v102_v24 }
 0x720   :  { %v774_v28 = vsel %vm112_vm4, %v772_v41, 0.0 }
 0x721   :  { %775 = vadd.xlane.f32.xlu1 %v774_v28  ;;  %v760_v47 = vpop.xlane.xlu0 %759 }
 0x722   :  { %v769_v43 = vmul.f32 %v2341_v38, %v760_v47 }
 0x724   :  { %v771_v44 = vsub.f32 %v754_v19, %v769_v43 }
 0x726   :  { %v773_v45 = vmul.f32 %v771_v44, %v771_v44 }
 0x728   :  { %v777_v46 = vsel %vm112_vm4, %v773_v45, 0.0 }
 0x729   :  { %778 = vadd.xlane.f32.xlu2 %v777_v46 }
 0x794   :  { %v776_v10 = vpop.xlane.xlu1 %775 }
 0x795   :  { %v780_v11 = vmul.f32 %v776_v10, %v2341_v38 }
 0x797   :  { %v782_v12 = vadd.f32 1e-06, %v780_v11 }
 0x799   :  { %1997 = vrsqrt.f32 %v782_v12  ;;  %vm790_vm10 = vweird.f32 %v782_v12 }
 0x79c   :  { %v779_v55 = vpop.xlane.xlu2 %778 }
 0x79d   :  { %v781_v56 = vmul.f32 %v779_v55, %v2341_v38 }
 0x79f   :  { %v1998_v21 = vpop.eup %1997  ;;  %v783_v22 = vadd.f32 1e-06, %v781_v56  ;;  %v1955_v56 = vpack.i.bf16 %v2420_v54, %v2414_v53 }
 0x7a0   :  { %v785_v58 = vmul.f32 %v1998_v21, %v782_v12  ;;  %vm791_vm9 = vweird.f32 %v1998_v21  ;;  %v2402_v12 = vld [vmem:[%s2666_s4 + $0x70] sm:$0xff] }
 0x7a1   :  { %1999 = vrsqrt.f32 %v783_v22  ;;  %vm792_vm11 = vmor %vm790_vm10, %vm791_vm9  ;;  %vm800_vm13 = vweird.f32 %v783_v22  ;;  %966 = vmatpush.msrb.mxu2 %v2402_v12  ;;  %v1950_v55 = vpack.i.bf16 %v2408_v52, %v2402_v12 }
 0x7a2   :  { %v786_v59 = vmul.f32 %v1998_v21, %v785_v58 }
 0x7a3   :  { %967 = vmatpush.msrb.mxu2 %v2408_v52 }
 0x7a4   :  { %v787_v60 = vmul.f32 0.5, %v786_v59 }
 0x7a5   :  { %968 = vmatpush.msrb.mxu2 %v2414_v53 }
 0x7a6   :  { %v788_v61 = vsub.f32 1.5, %v787_v60 }
 0x7a7   :  { %v2000_v62 = vpop.eup %1999  ;;  %969 = vmatpush.msrb.mxu2 %v2420_v54 }
 0x7a8   :  { %v789_v63 = vmul.f32 %v1998_v21, %v788_v61  ;;  %v795_v0 = vmul.f32 %v2000_v62, %v783_v22  ;;  %vm801_vm12 = vweird.f32 %v2000_v62 }
 0x7a9   :  { %vm802_vm14 = vmor %vm800_vm13, %vm801_vm12 }
 0x7aa   :  { %v793_v2 = vsel %vm792_vm11, %v1998_v21, %v789_v63  ;;  %v796_v3 = vmul.f32 %v2000_v62, %v795_v0 }
 0x7ab   :  { %v804_v4 = vmul.f32 %v793_v2, %v770_v40 }
 0x7ac   :  { %v797_v6 = vmul.f32 0.5, %v796_v3 }
 0x7ad   :  { %v807_v7 = vmul.f32 %v806_v1, %v804_v4  ;;  %v921_v4 = vperm.slane %v2212_v29, 6 }
 0x7ae   :  { %v798_v8 = vsub.f32 1.5, %v797_v6 }
 0x7af   :  { %v810_v9 = vadd.f32 %v809_v5, %v807_v7 }
 0x7b0   :  { %v799_v13 = vmul.f32 %v2000_v62, %v798_v8  ;;  %v924_v8 = vperm.slane %v2212_v29, 7  ;;  %v2442_v29 = vld [vmem:[%s2668_s6 + $0x8] sm:$0xff] }
 0x7b1   :  { %1831 = vmatmul.msk.f32.vlgmr.msrb.gmra.mxu0 %vm112_vm4, %v810_v9 }
 0x7b2   :  { %v803_v14 = vsel %vm802_vm14, %v2000_v62, %v799_v13 }
 0x7b3   :  { %v805_v15 = vmul.f32 %v803_v14, %v771_v44 }
 0x7b5   :  { %v808_v18 = vmul.f32 %v806_v1, %v805_v15 }
 0x7b7   :  { %v811_v16 = vadd.f32 %v809_v5, %v808_v18 }
 0x7b9   :  { %1832 = vmatmul.msk.f32.gmra.mxu0 %vm112_vm4, %v811_v16 }
 0x82e   :  { %v836_v27 = vpop.f32.mrf.mxu0 }
 0x82f   :  { %v837_v19 = vadd.f32 %v836_v27, %v812_v26 }
 0x831   :  { %v842_v30 = vmax.f32 %v837_v19, 0.0 }
 0x833   :  { %1833 = vmatmul.msk.f32.vlgmr.msra.gmra.mxu1 %vm845_vm15, %v842_v30 }
 0x836   :  { %v839_v31 = vpop.f32.mrf.mxu0 }
 0x837   :  { %v840_v32 = vadd.f32 %v839_v31, %v812_v26  ;;  %v947_v26 = vperm.slane %v2442_v29, 0 }
 0x839   :  { %v843_v33 = vmax.f32 %v840_v32, 0.0 }
 0x83b   :  { %1834 = vmatmul.msk.f32.gmra.mxu1 %vm845_vm15, %v843_v33 }
 0x8b0   :  { %v869_v35 = vpop.f32.mrf.mxu1 }
 0x8b1   :  { %v870_v36 = vadd.f32 %v869_v35, %v844_v34 }
 0x8b3   :  { %v875_v25 = vadd.f32 %v870_v36, %v810_v9 }
 0x8b5   :  { %v877_v39 = vsel %vm112_vm4, %v875_v25, 0.0 }
 0x8b6   :  { %878 = vadd.xlane.f32.xlu0 %v877_v39 }
 0x8b8   :  { %v872_v40 = vpop.f32.mrf.mxu1 }
 0x8b9   :  { %v873_v41 = vadd.f32 %v872_v40, %v844_v34 }
 0x8bb   :  { %v876_v28 = vadd.f32 %v873_v41, %v811_v16 }
 0x8bd   :  { %v880_v47 = vsel %vm112_vm4, %v876_v28, 0.0 }
 0x8be   :  { %881 = vadd.xlane.f32.xlu1 %v880_v47 }
 0x929   :  { %v879_v43 = vpop.xlane.xlu0 %878 }
 0x92a   :  { %v883_v44 = vmul.f32 %v879_v43, %v2341_v38 }
 0x92c   :  { %v885_v45 = vsub.f32 %v875_v25, %v883_v44 }
 0x92e   :  { %v887_v46 = vmul.f32 %v885_v45, %v885_v45 }
 0x930   :  { %v889_v48 = vsel %vm112_vm4, %v887_v46, 0.0 }
 0x931   :  { %v882_v49 = vpop.xlane.xlu1 %881  ;;  %890 = vadd.xlane.f32.xlu2 %v889_v48 }
 0x932   :  { %v884_v50 = vmul.f32 %v882_v49, %v2341_v38 }
 0x934   :  { %v886_v51 = vsub.f32 %v876_v28, %v884_v50 }
 0x936   :  { %v888_v10 = vmul.f32 %v886_v51, %v886_v51 }
 0x938   :  { %v892_v11 = vsel %vm112_vm4, %v888_v10, 0.0 }
 0x939   :  { %893 = vadd.xlane.f32.xlu0 %v892_v11 }
 0x9a4   :  { %v891_v20 = vpop.xlane.xlu2 %890 }
 0x9a5   :  { %v895_v21 = vmul.f32 %v891_v20, %v2341_v38 }
 0x9a7   :  { %v897_v22 = vadd.f32 1e-06, %v895_v21 }
 0x9a9   :  { %2001 = vrsqrt.f32 %v897_v22  ;;  %vm905_vm1 = vweird.f32 %v897_v22 }
 0x9ac   :  { %v894_v57 = vpop.xlane.xlu0 %893 }
 0x9ad   :  { %v896_v58 = vmul.f32 %v894_v57, %v2341_v38 }
 0x9af   :  { %v2002_v59 = vpop.eup %2001  ;;  %v898_v60 = vadd.f32 1e-06, %v896_v58 }
 0x9b0   :  { %v900_v61 = vmul.f32 %v2002_v59, %v897_v22  ;;  %vm906_vm0 = vweird.f32 %v2002_v59 }
 0x9b1   :  { %2003 = vrsqrt.f32 %v898_v60  ;;  %vm907_vm2 = vmor %vm905_vm1, %vm906_vm0  ;;  %vm915_vm8 = vweird.f32 %v898_v60 }
 0x9b2   :  { %v901_v62 = vmul.f32 %v2002_v59, %v900_v61 }
 0x9b4   :  { %v902_v63 = vmul.f32 0.5, %v901_v62 }
 0x9b6   :  { %v903_v0 = vsub.f32 1.5, %v902_v63 }
 0x9b7   :  { %v2004_v1 = vpop.eup %2003 }
 0x9b8   :  { %v904_v2 = vmul.f32 %v2002_v59, %v903_v0  ;;  %v910_v3 = vmul.f32 %v2004_v1, %v898_v60  ;;  %vm916_vm3 = vweird.f32 %v2004_v1 }
 0x9b9   :  { %vm917_vm9 = vmor %vm915_vm8, %vm916_vm3  ;;  %vm1756_vm3 = vcmask 1041409   ;;  %vm1780_vm8 = vcmask 9216  }
 0x9ba   :  { %v908_v5 = vsel %vm907_vm2, %v2002_v59, %v904_v2  ;;  %v911_v6 = vmul.f32 %v2004_v1, %v910_v3 }
 0x9bb   :  { %v919_v7 = vmul.f32 %v908_v5, %v885_v45 }
 0x9bc   :  { %v912_v9 = vmul.f32 0.5, %v911_v6 }
 0x9bd   :  { %v922_v13 = vmul.f32 %v921_v4, %v919_v7 }
 0x9be   :  { %v913_v14 = vsub.f32 1.5, %v912_v9 }
 0x9bf   :  { %v2431_v15 = vadd.f32 %v924_v8, %v922_v13 }
 0x9c0   :  { %v914_v18 = vmul.f32 %v2004_v1, %v913_v14 }
 0x9c1   :  { %1852 = vmatmul.msk.f32.vlgmr.msrb.gmra.mxu2 %vm112_vm4, %v2431_v15 }
 0x9c2   :  { %v918_v16 = vsel %vm917_vm9, %v2004_v1, %v914_v18 }
 0x9c3   :  { %v920_v17 = vmul.f32 %v918_v16, %v886_v51 }
 0x9c5   :  { %v923_v23 = vmul.f32 %v921_v4, %v920_v17 }
 0x9c7   :  { %v2435_v24 = vadd.f32 %v924_v8, %v923_v23 }
 0x9c9   :  { %1853 = vmatmul.msk.f32.gmra.mxu2 %vm112_vm4, %v2435_v24 }
 0xa44   :  { %v971_v27 = vpop.f32.mrf.mxu2 }
 0xa45   :  { %v2445_v19 = vadd.f32 %v971_v27, %v947_v26 }
 0xa47   :  { %1109 = vrot.lane.b32.xlu0 %v2445_v19, %s2078_s26  ;;  %978 = vrot.lane.b32.xlu1 %v2445_v19, %s2073_s18 }
 0xa4c   :  { %v974_v30 = vpop.f32.mrf.mxu2 }
 0xa4d   :  { %v2451_v31 = vadd.f32 %v974_v30, %v947_v26 }
 0xa4f   :  { %1107 = vrot.lane.b32.xlu1 %v2445_v19, %s2074_s3  ;;  %1137 = vrot.lane.b32.xlu0 %v2451_v31, %s2078_s26  ;;  %v1935_v23 = vpack.i.bf16 %v2451_v31, %v2445_v19 }
 0xa50   :  { %1005 = vrot.lane.b32.xlu2 %v2451_v31, %s2073_s18 }
 0xa57   :  { %1135 = vrot.lane.b32.xlu1 %v2451_v31, %s2074_s3  ;;  %1239 = vrot.lane.b32.xlu0 %v2445_v19, %s2079_s1 }
 0xa58   :  { %1241 = vrot.lane.b32.xlu2 %v2445_v19, %s2076_s20 }
 0xa5f   :  { %1373 = vrot.lane.b32.xlu1 %v2445_v19, %s2075_s19  ;;  %1267 = vrot.lane.b32.xlu0 %v2451_v31, %s2079_s1 }
 0xa60   :  { %1269 = vrot.lane.b32.xlu2 %v2451_v31, %s2076_s20 }
 0xa67   :  { %1401 = vrot.lane.b32.xlu1 %v2451_v31, %s2075_s19  ;;  %1399 = vrot.lane.b32.xlu0 %v2451_v31, %s2080_s27 }
 0xa68   :  { %1371 = vrot.lane.b32.xlu2 %v2445_v19, %s2080_s27 }
 0xaaa   :  { %v1006_v32 = vpop.permute.xlu2 %1005 }
 0xaab   :  { %1856 = vmatpush.xpose.msk.msra.mxu0 %vm151_vm5, %v1006_v32 }
 0xaae   :  { %1857 = vmatmul.msk.f32.vlgmr.msra.gmra.mxu0 %vm151_vm5, %v2451_v31 }
 0xab2   :  { %v1242_v33 = vpop.permute.xlu2 %1241 }
 0xab9   :  { %v979_v34 = vpop.permute.xlu1 %978  ;;  %v1110_v35 = vpop.permute.xlu0 %1109 }
 0xaba   :  { %1854 = vmatpush.xpose.msk.msrb.mxu3 %vm151_vm5, %v979_v34  ;;  %1860 = vmatpush.xpose.msk.msrb.mxu0 %vm151_vm5, %v1110_v35  ;;  %v1270_v39 = vpop.permute.xlu2 %1269 }
 0xabd   :  { %1855 = vmatmul.msk.f32.vlgmr.msrb.gmra.mxu3 %vm151_vm5, %v2445_v19 }
 0xabe   :  { %1866 = vmatpush.xpose.msk.msra.mxu0 %vm151_vm5, %v1242_v33 }
 0xac1   :  { %v1108_v36 = vpop.permute.xlu1 %1107  ;;  %v1138_v25 = vpop.permute.xlu0 %1137 }
 0xac2   :  { %1861 = vmatmul.msk.f32.vlgmr.msrb.gmra.mxu0 %vm151_vm5, %v1108_v36  ;;  %1862 = vmatpush.xpose.msk.msrb.mxu1 %vm151_vm5, %v1138_v25  ;;  %v1372_v43 = vpop.permute.xlu2 %1371 }
 0xac6   :  { %1868 = vmatpush.xpose.msk.msra.mxu1 %vm151_vm5, %v1270_v39 }
 0xac9   :  { %v1136_v40 = vpop.permute.xlu1 %1135  ;;  %v1240_v41 = vpop.permute.xlu0 %1239 }
 0xaca   :  { %1863 = vmatmul.msk.f32.vlgmr.msrb.gmra.mxu1 %vm151_vm5, %v1136_v40  ;;  %1867 = vmatmul.msk.f32.vlgmr.msra.gmra.mxu0 %vm151_vm5, %v1240_v41 }
 0xad1   :  { %v1374_v28 = vpop.permute.xlu1 %1373  ;;  %v1268_v47 = vpop.permute.xlu0 %1267 }
 0xad2   :  { %1869 = vmatmul.msk.f32.vlgmr.msra.gmra.mxu1 %vm151_vm5, %v1268_v47  ;;  %1872 = vmatpush.xpose.msk.msrb.mxu0 %vm151_vm5, %v1374_v28 }
 0xad5   :  { %1873 = vmatmul.msk.f32.vlgmr.msrb.gmra.mxu0 %vm151_vm5, %v1372_v43 }
 0xad9   :  { %v1402_v44 = vpop.permute.xlu1 %1401  ;;  %v1400_v45 = vpop.permute.xlu0 %1399 }
 0xada   :  { %1874 = vmatpush.xpose.msk.msrb.mxu1 %vm151_vm5, %v1402_v44 }
 0xadd   :  { %1875 = vmatmul.msk.f32.vlgmr.msrb.gmra.mxu1 %vm151_vm5, %v1400_v45 }
 0xb2b   :  { %v1028_v46 = vpop.f32.mrf.mxu0 }
 0xb2c   :  { %v1029_v48 = vadd.f32 %v2240_v42, %v1028_v46 }
 0xb2e   :  { %v1032_v49 = vmul.f32 0.17677669, %v1029_v48 }
 0xb30   :  { %v1036_v50 = vsel %vm151_vm5, %v1032_v49, -inf }
 0xb31   :  { %1037 = vmax.xlane.f32.xlu1 %v1036_v50 }
 0xb3f   :  { %v1132_v51 = vpop.f32.mrf.mxu0 }
 0xb40   :  { %v1133_v10 = vadd.f32 %v2233_v37, %v1132_v51  ;;  %v1001_v11 = vpop.f32.mrf.mxu3 }
 0xb41   :  { %v1002_v20 = vadd.f32 %v2233_v37, %v1001_v11 }
 0xb42   :  { %v1163_v21 = vmul.f32 0.17677669, %v1133_v10 }
 0xb43   :  { %v1031_v22 = vmul.f32 0.17677669, %v1002_v20 }
 0xb44   :  { %v1165_v57 = vsel %vm151_vm5, %v1163_v21, -inf }
 0xb45   :  { %1166 = vmax.xlane.f32.xlu0 %v1165_v57  ;;  %v1033_v58 = vsel %vm151_vm5, %v1031_v22, -inf }
 0xb46   :  { %1034 = vmax.xlane.f32.xlu2 %v1033_v58 }
 0xb47   :  { %v1160_v59 = vpop.f32.mrf.mxu1  ;;  %v1264_v60 = vpop.f32.mrf.mxu0 }
 0xb48   :  { %v1161_v61 = vadd.f32 %v2240_v42, %v1160_v59  ;;  %v1265_v62 = vadd.f32 %v2233_v37, %v1264_v60 }
 0xb4a   :  { %v1164_v63 = vmul.f32 0.17677669, %v1161_v61  ;;  %v1295_v0 = vmul.f32 0.17677669, %v1265_v62 }
 0xb4c   :  { %v1297_v1 = vsel %vm151_vm5, %v1295_v0, -inf  ;;  %v1168_v2 = vsel %vm151_vm5, %v1164_v63, -inf }
 0xb4d   :  { %1298 = vmax.xlane.f32.xlu1 %v1297_v1 }
 0xb4e   :  { %1169 = vmax.xlane.f32.xlu2 %v1168_v2 }
 0xb4f   :  { %v1292_v3 = vpop.f32.mrf.mxu1 }
 0xb50   :  { %v1293_v4 = vadd.f32 %v2240_v42, %v1292_v3 }
 0xb52   :  { %v1296_v5 = vmul.f32 0.17677669, %v1293_v4  ;;  %v1396_v6 = vpop.f32.mrf.mxu0 }
 0xb53   :  { %v1397_v7 = vadd.f32 %v2233_v37, %v1396_v6 }
 0xb54   :  { %v1300_v8 = vsel %vm151_vm5, %v1296_v5, -inf }
 0xb55   :  { %v1427_v9 = vmul.f32 0.17677669, %v1397_v7 }
 0xb56   :  { %1301 = vmax.xlane.f32.xlu2 %v1300_v8 }
 0xb57   :  { %v1429_v13 = vsel %vm151_vm5, %v1427_v9, -inf }
 0xb58   :  { %1430 = vmax.xlane.f32.xlu0 %v1429_v13 }
 0xb5a   :  { %v1424_v14 = vpop.f32.mrf.mxu1 }
 0xb5b   :  { %v1425_v18 = vadd.f32 %v2240_v42, %v1424_v14 }
 0xb5d   :  { %v2510_v16 = vmul.f32 0.17677669, %v1425_v18 }
 0xb5f   :  { %v1432_v17 = vsel %vm151_vm5, %v2510_v16, -inf }
 0xb60   :  { %1433 = vmax.xlane.f32.xlu1 %v1432_v17 }
 0xb6e   :  { %1936 = vrot.lane.b32.xlu2 %v1935_v23, %s2077_s25  ;;  %s2089_s25 = smov [#allocation2]  }
 0xb6f   :  { %s1787_s26 = sshll.u32 %s2089_s25, 4  ;;  %s1788_s26 = int_to_ptr.vmem [resolvable:$true] %s1787_s26 }
 0xba4   :  { %v1038_v37 = vpop.xlane.xlu1 %1037 }
 0xba5   :  { %v1040_v26 = vsub.f32 %v1032_v49, %v1038_v37 }
 0xba7   :  { %v1043_v27 = vmul.f32 1.442695, %v1040_v26 }
 0xba9   :  { %2005 = vpow2.f32 %v1043_v27 }
 0xbaf   :  { %v2517_v30 = vpop.eup %2005 }
 0xbb0   :  { %v1048_v42 = vsel %vm151_vm5, %v2517_v30, 0.0 }
 0xbb1   :  { %1049 = vadd.xlane.f32.xlu0 %v1048_v42 }
 0xbb8   :  { %v1167_v32 = vpop.xlane.xlu0 %1166 }
 0xbb9   :  { %v1171_v33 = vsub.f32 %v1163_v21, %v1167_v32  ;;  %v1035_v34 = vpop.xlane.xlu2 %1034 }
 0xbba   :  { %v1039_v35 = vsub.f32 %v1031_v22, %v1035_v34 }
 0xbbb   :  { %v1173_v36 = vmul.f32 1.442695, %v1171_v33 }
 0xbbc   :  { %v1041_v25 = vmul.f32 1.442695, %v1039_v35 }
 0xbbd   :  { %2007 = vpow2.f32 %v1173_v36 }
 0xbbe   :  { %2009 = vpow2.f32 %v1041_v25 }
 0xbc0   :  { %v1299_v45 = vpop.xlane.xlu1 %1298 }
 0xbc1   :  { %v1170_v39 = vpop.xlane.xlu2 %1169  ;;  %v1303_v50 = vsub.f32 %v1295_v0, %v1299_v45 }
 0xbc2   :  { %v1172_v40 = vsub.f32 %v1164_v63, %v1170_v39 }
 0xbc3   :  { %v2521_v41 = vpop.eup %2007  ;;  %v1305_v11 = vmul.f32 1.442695, %v1303_v50 }
 0xbc4   :  { %v2010_v28 = vpop.eup %2009  ;;  %v1175_v47 = vmul.f32 1.442695, %v1172_v40  ;;  %v1177_v43 = vsel %vm151_vm5, %v2521_v41, 0.0 }
 0xbc5   :  { %1178 = vadd.xlane.f32.xlu1 %v1177_v43  ;;  %v1045_v44 = vsel %vm151_vm5, %v2010_v28, 0.0 }
 0xbc6   :  { %2011 = vpow2.f32 %v1175_v47  ;;  %1046 = vadd.xlane.f32.xlu2 %v1045_v44 }
 0xbc9   :  { %v1302_v46 = vpop.xlane.xlu2 %1301 }
 0xbca   :  { %v1304_v48 = vsub.f32 %v1296_v5, %v1302_v46 }
 0xbcb   :  { %v1431_v20 = vpop.xlane.xlu0 %1430 }
 0xbcc   :  { %v2526_v49 = vpop.eup %2011  ;;  %v1307_v51 = vmul.f32 1.442695, %v1304_v48  ;;  %v1435_v59 = vsub.f32 %v1427_v9, %v1431_v20 }
 0xbcd   :  { %v1180_v10 = vsel %vm151_vm5, %v2526_v49, 0.0 }
 0xbce   :  { %2013 = vpow2.f32 %v1307_v51  ;;  %1181 = vadd.xlane.f32.xlu0 %v1180_v10  ;;  %v1437_v61 = vmul.f32 1.442695, %v1435_v59 }
 0xbcf   :  { %2015 = vpow2.f32 %v1305_v11 }
 0xbd0   :  { %2017 = vpow2.f32 %v1437_v61 }
 0xbd1   :  { %v1937_v21 = vpop.permute.xlu2 %1936 }
 0xbd2   :  { %v1939_v22 = vunpack.i.h.bf16 %v1937_v21  ;;  %v1938_v57 = vunpack.i.l.bf16 %v1937_v21 }
 0xbd3   :  { %v1434_v2 = vpop.xlane.xlu1 %1433 }
 0xbd4   :  { %v2530_v58 = vpop.eup %2013  ;;  %1076 = vmatpush.msra.mxu2 %v1938_v57  ;;  %1102 = vmatpush.msra.mxu3 %v1939_v22  ;;  %v1436_v3 = vsub.f32 %v2510_v16, %v1434_v2 }
 0xbd5   :  { %v1312_v60 = vsel %vm151_vm5, %v2530_v58, 0.0  ;;  %v2016_v62 = vpop.eup %2015 }
 0xbd6   :  { %1313 = vadd.xlane.f32.xlu1 %v1312_v60  ;;  %v1309_v63 = vsel %vm151_vm5, %v2016_v62, 0.0  ;;  %v2018_v0 = vpop.eup %2017  ;;  %v1439_v4 = vmul.f32 1.442695, %v1436_v3 }
 0xbd7   :  { %v1441_v1 = vsel %vm151_vm5, %v2018_v0, 0.0 }
 0xbd8   :  { %2019 = vpow2.f32 %v1439_v4 }
 0xbde   :  { %1946 = vrot.lane.b32.xlu2 %v1935_v23, %s2082_s29  ;;  %1310 = vadd.xlane.f32.xlu1 %v1309_v63 }
 0xbe2   :  { %1941 = vrot.lane.b32.xlu0 %v1935_v23, %s2081_s28  ;;  %s1789_s28 = sshll.u32 %s2671_s9, 4  ;;  %s1790_s28 = int_to_ptr.hbm [resolvable:$true] %s1789_s28 }
 0xbe6   :  { %1477 = vrot.lane.b32.xlu2 %v2451_v31, %s2083_s0  ;;  %1442 = vadd.xlane.f32.xlu1 %v1441_v1  ;;  %v2020_v31 = vpop.eup %2019 }
 0xbe7   :  { %v1444_v5 = vsel %vm151_vm5, %v2020_v31, 0.0 }
 0xbee   :  { %1951 = vrot.lane.b32.xlu2 %v1950_v55, %s2084_s2 }
 0xbf6   :  { %1956 = vrot.lane.b32.xlu2 %v1955_v56, %s2084_s2 }
 0xbff   :  { %1451 = vrot.lane.b32.xlu1 %v2445_v19, %s2083_s0 }
 0xc0c   :  { %1445 = vadd.xlane.f32.xlu0 %v1444_v5 }
 0xc24   :  { %v1050_v6 = vpop.xlane.xlu0 %1049 }
 0xc25   :  { %2021 = vrcp.f32 %v1050_v6 }
 0xc2b   :  { %v2022_v12 = vpop.eup %2021 }
 0xc2c   :  { %v1054_v52 = vmul.f32 %v2022_v12, %v2517_v30 }
 0xc2e   :  { %1859 = vmatmul.msk.f32.vlgmr.msra.gmra.mxu3 %vm151_vm5, %v1054_v52 }
 0xc38   :  { %v1179_v55 = vpop.xlane.xlu1 %1178 }
 0xc39   :  { %v1047_v53 = vpop.xlane.xlu2 %1046 }
 0xc3a   :  { %2023 = vrcp.f32 %v1047_v53 }
 0xc3b   :  { %2025 = vrcp.f32 %v1179_v55 }
 0xc40   :  { %v2024_v54 = vpop.eup %2023 }
 0xc41   :  { %v1053_v56 = vmul.f32 %v2024_v54, %v2010_v28  ;;  %v1182_v7 = vpop.xlane.xlu0 %1181  ;;  %v1947_v8 = vpop.permute.xlu2 %1946 }
 0xc42   :  { %2027 = vrcp.f32 %v1182_v7  ;;  %v2026_v9 = vpop.eup %2025  ;;  %v1949_v26 = vunpack.i.h.bf16 %v1947_v8  ;;  %v1948_v27 = vunpack.i.l.bf16 %v1947_v8 }
 0xc43   :  { %1858 = vmatmul.msk.f32.vlgmr.msra.gmra.mxu2 %vm151_vm5, %v1053_v56  ;;  %v1185_v23 = vmul.f32 %v2026_v9, %v2521_v41 }
 0xc48   :  { %v2028_v14 = vpop.eup %2027 }
 0xc49   :  { %v1314_v19 = vpop.xlane.xlu1 %1313  ;;  %v1186_v37 = vmul.f32 %v2028_v14, %v2526_v49  ;;  %v1478_v30 = vpop.permute.xlu2 %1477 }
 0xc4a   :  { %2029 = vrcp.f32 %v1314_v19 }
 0xc50   :  { %v2030_v42 = vpop.eup %2029 }
 0xc51   :  { %v1311_v13 = vpop.xlane.xlu1 %1310  ;;  %v1318_v33 = vmul.f32 %v2030_v42, %v2530_v58  ;;  %v1952_v49 = vpop.permute.xlu2 %1951 }
 0xc52   :  { %2031 = vrcp.f32 %v1311_v13  ;;  %v1954_v50 = vunpack.i.h.bf16 %v1952_v49  ;;  %v1953_v51 = vunpack.i.l.bf16 %v1952_v49 }
 0xc54   :  { %v1942_v18 = vpop.permute.xlu0 %1941  ;;  %1568 = vmatpush.msra.mxu0 %v1953_v51 }
 0xc55   :  { %v1944_v16 = vunpack.i.h.bf16 %v1942_v18  ;;  %v1943_v17 = vunpack.i.l.bf16 %v1942_v18 }
 0xc56   :  { %1569 = vmatpush.msra.mxu0 %v1954_v50  ;;  %v1628_v50 = vperm.slane %v2442_v29, 5 }
 0xc57   :  { %1208 = vmatpush.msrb.mxu2 %v1943_v17  ;;  %1234 = vmatpush.msrb.mxu3 %v1944_v16 }
 0xc58   :  { %1864 = vmatmul.msk.f32.vlgmr.msrb.gmra.mxu2 %vm151_vm5, %v1185_v23  ;;  %1865 = vmatmul.msk.f32.vlgmr.msrb.gmra.mxu3 %vm151_vm5, %v1186_v37  ;;  %v2032_v32 = vpop.eup %2031  ;;  %v1840_v23 = vld [vmem:[%s2666_s4 + $0x68] sm:$0xff]  ;;  %v1838_v37 = vld [vmem:[%s2666_s4 + $0x58] sm:$0xff] }
 0xc59   :  { %1340 = vmatpush.msra.mxu2 %v1948_v27  ;;  %1366 = vmatpush.msra.mxu3 %v1949_v26  ;;  %v1317_v34 = vmul.f32 %v2032_v32, %v2016_v62  ;;  %v1443_v35 = vpop.xlane.xlu1 %1442  ;;  %v1957_v10 = vpop.permute.xlu2 %1956  ;;  %v1836_v26 = vld [vmem:[%s2666_s4 + $0x48] sm:$0xff] }
 0xc5a   :  { %2033 = vrcp.f32 %v1443_v35  ;;  %v1959_v20 = vunpack.i.h.bf16 %v1957_v10  ;;  %v1958_v21 = vunpack.i.l.bf16 %v1957_v10  ;;  %v1849_v35 = vld [vmem:[%s2667_s5 + $0x70] sm:$0xff] }
 0xc5b   :  { %1498 = vmatpush.msrb.mxu3 %v1478_v30 }
 0xc5c   :  { %1570 = vmatpush.msra.mxu0 %v1958_v21 }
 0xc5e   :  { %1571 = vmatpush.msra.mxu0 %v1959_v20 }
 0xc60   :  { %1870 = vmatmul.msk.f32.vlgmr.msra.gmra.mxu2 %vm151_vm5, %v1317_v34  ;;  %1871 = vmatmul.msk.f32.vlgmr.msra.gmra.mxu3 %vm151_vm5, %v1318_v33  ;;  %v2034_v36 = vpop.eup %2033  ;;  %v1850_v34 = vld [vmem:[%s2667_s5 + $0x78] sm:$0xff] }
 0xc61   :  { %v1449_v25 = vmul.f32 %v2034_v36, %v2018_v0 }
 0xc71   :  { %v1452_v39 = vpop.permute.xlu1 %1451 }
 0xc72   :  { %1472 = vmatpush.msrb.mxu2 %v1452_v39 }
 0xc73   :  { %1876 = vmatmul.msk.f32.vlgmr.msrb.gmra.mxu2 %vm151_vm5, %v1449_v25  ;;  %v1848_v25 = vld [vmem:[%s2667_s5 + $0x68] sm:$0xff] }
 0xc74   :  { %1678 = vmatpush.msra.mxu2 %v1850_v34 }
 0xc76   :  { %1679 = vmatpush.msra.mxu2 %v1849_v35  ;;  %v1746_v35 = vld [vmem:[%s2669_s7 + $0x8] sm:$0xff] }
 0xc78   :  { %1680 = vmatpush.msra.mxu2 %v1848_v25 }
 0xc7f   :  { %v1446_v40 = vpop.xlane.xlu0 %1445 }
 0xc80   :  { %2035 = vrcp.f32 %v1446_v40 }
 0xc86   :  { %v2036_v41 = vpop.eup %2035 }
 0xc87   :  { %v1450_v28 = vmul.f32 %v2036_v41, %v2020_v31  ;;  %v1533_v31 = vperm.slane %v2442_v29, 1 }
 0xc89   :  { %1877 = vmatmul.msk.f32.vlgmr.msrb.gmra.mxu3 %vm151_vm5, %v1450_v28  ;;  %v1847_v28 = vld [vmem:[%s2667_s5 + $0x60] sm:$0xff] }
 0xc8a   :  { %1681 = vmatpush.msra.mxu2 %v1847_v28 }
 0xcb1   :  { %v1104_v47 = vpop.f32.mrf.mxu3 }
 0xcc6   :  { %v1078_v43 = vpop.f32.mrf.mxu2 }
 0xcdb   :  { %v1210_v44 = vpop.f32.mrf.mxu2  ;;  %v1236_v45 = vpop.f32.mrf.mxu3 }
 0xcdc   :  { %1505 = vrot.lane.b32.xlu2 %v1210_v44, %s2085_s30  ;;  %v1846_v44 = vld [vmem:[%s2667_s5 + $0x58] sm:$0xff] }
 0xcdd   :  { %1682 = vmatpush.msra.mxu2 %v1846_v44 }
 0xce3   :  { %v1342_v46 = vpop.f32.mrf.mxu2  ;;  %v1368_v48 = vpop.f32.mrf.mxu3 }
 0xce4   :  { %1515 = vrot.lane.b32.xlu0 %v1368_v48, %s2086_s10  ;;  %1513 = vrot.lane.b32.xlu1 %v1342_v46, %s2086_s10  ;;  %v1625_v46 = vperm.slane %v2442_v29, 4 }
 0xcec   :  { %1507 = vrot.lane.b32.xlu1 %v1236_v45, %s2085_s30 }
 0xcf6   :  { %v1474_v11 = vpop.f32.mrf.mxu2 }
 0xcf7   :  { %1521 = vrot.lane.b32.xlu2 %v1474_v11, %s2087_s11 }
 0xd0c   :  { %v1500_v22 = vpop.f32.mrf.mxu3 }
 0xd0d   :  { %1523 = vrot.lane.b32.xlu2 %v1500_v22, %s2087_s11 }
 0xd36   :  { %v1506_v57 = vpop.permute.xlu2 %1505 }
 0xd37   :  { %v1527_v58 = vsel %vm151_vm5, %v1078_v43, %v1506_v57 }
 0xd51   :  { %v1522_v60 = vpop.permute.xlu2 %1521 }
 0xd56   :  { %v1514_v59 = vpop.permute.xlu1 %1513  ;;  %v1516_v1 = vpop.permute.xlu0 %1515 }
 0xd57   :  { %v1529_v61 = vsel %vm701_vm6, %v1527_v58, %v1514_v59 }
 0xd58   :  { %v1531_v62 = vsel %vm704_vm7, %v1529_v61, %v1522_v60 }
 0xd59   :  { %1878 = vmatmul.msk.f32.vlgmr.msra.gmra.mxu0 %vm112_vm4, %v1531_v62 }
 0xd5e   :  { %v1508_v63 = vpop.permute.xlu1 %1507 }
 0xd5f   :  { %v1528_v0 = vsel %vm151_vm5, %v1104_v47, %v1508_v63  ;;  %v1845_v63 = vld [vmem:[%s2667_s5 + $0x50] sm:$0xff] }
 0xd60   :  { %v1530_v3 = vsel %vm701_vm6, %v1528_v0, %v1516_v1  ;;  %1683 = vmatpush.msra.mxu2 %v1845_v63  ;;  %v1844_v0 = vld [vmem:[%s2667_s5 + $0x48] sm:$0xff]  ;;  %v1843_v1 = vld [vmem:[%s2667_s5 + $0x40] sm:$0xff] }
 0xd61   :  { %v1962_v63 = vld [vmem:[%s2670_s8] ss:$0 sm:$0xff] }
 0xd62   :  { %1684 = vmatpush.msra.mxu2 %v1844_v0 }
 0xd64   :  { %1685 = vmatpush.msra.mxu2 %v1843_v1 }
 0xd67   :  { %v1524_v2 = vpop.permute.xlu2 %1523 }
 0xd68   :  { %v1532_v4 = vsel %vm704_vm7, %v1530_v3, %v1524_v2  ;;  %v1631_v2 = vperm.slane %v2442_v29, 2 }
 0xd69   :  { %1879 = vmatmul.msk.f32.gmra.mxu0 %vm112_vm4, %v1532_v4 }
 0xdd6   :  { %v1573_v5 = vpop.f32.mrf.mxu0 }
 0xdd7   :  { %v1574_v6 = vadd.f32 %v1573_v5, %v1533_v31 }
 0xdd9   :  { %v1579_v12 = vadd.f32 %v1574_v6, %v2431_v15 }
 0xddb   :  { %v1581_v52 = vsel %vm112_vm4, %v1579_v12, 0.0 }
 0xddc   :  { %1582 = vadd.xlane.f32.xlu1 %v1581_v52  ;;  %v1663_v52 = vperm.slane %v2442_v29, 3 }
 0xde6   :  { %v1576_v53 = vpop.f32.mrf.mxu0 }
 0xde7   :  { %v1577_v54 = vadd.f32 %v1576_v53, %v1533_v31 }
 0xde9   :  { %v1580_v55 = vadd.f32 %v1577_v54, %v2435_v24  ;;  %v1842_v24 = vld [vmem:[%s2666_s4 + $0x78] sm:$0xff] }
 0xdea   :  { %1650 = vmatpush.msra.mxu1 %v1842_v24 }
 0xdeb   :  { %v1584_v56 = vsel %vm112_vm4, %v1580_v55, 0.0 }
 0xdec   :  { %1585 = vadd.xlane.f32.xlu2 %v1584_v56  ;;  %1651 = vmatpush.msra.mxu1 %v1840_v23 }
 0xdee   :  { %1652 = vmatpush.msra.mxu1 %v1838_v37 }
 0xdf0   :  { %1653 = vmatpush.msra.mxu1 %v1836_v26 }
 0xe4f   :  { %v1583_v19 = vpop.xlane.xlu1 %1582 }
 0xe50   :  { %v1587_v7 = vmul.f32 %v1583_v19, %v2341_v38 }
 0xe52   :  { %v1589_v8 = vsub.f32 %v1579_v12, %v1587_v7 }
 0xe54   :  { %v1591_v9 = vmul.f32 %v1589_v8, %v1589_v8 }
 0xe56   :  { %v1593_v13 = vsel %vm112_vm4, %v1591_v9, 0.0 }
 0xe57   :  { %1594 = vadd.xlane.f32.xlu0 %v1593_v13 }
 0xe5f   :  { %v1586_v14 = vpop.xlane.xlu2 %1585 }
 0xe60   :  { %v1588_v15 = vmul.f32 %v1586_v14, %v2341_v38 }
 0xe62   :  { %v1590_v18 = vsub.f32 %v1580_v55, %v1588_v15 }
 0xe64   :  { %v1592_v16 = vmul.f32 %v1590_v18, %v1590_v18 }
 0xe66   :  { %v1596_v17 = vsel %vm112_vm4, %v1592_v16, 0.0 }
 0xe67   :  { %1597 = vadd.xlane.f32.xlu1 %v1596_v17 }
 0xeca   :  { %v1595_v27 = vpop.xlane.xlu0 %1594 }
 0xecb   :  { %v1599_v30 = vmul.f32 %v1595_v27, %v2341_v38 }
 0xecd   :  { %v1601_v42 = vadd.f32 1e-06, %v1599_v30 }
 0xecf   :  { %2037 = vrsqrt.f32 %v1601_v42  ;;  %vm1609_vm6 = vweird.f32 %v1601_v42 }
 0xed5   :  { %v2038_v32 = vpop.eup %2037 }
 0xed6   :  { %v1604_v33 = vmul.f32 %v2038_v32, %v1601_v42  ;;  %vm1610_vm5 = vweird.f32 %v2038_v32 }
 0xed7   :  { %vm1611_vm7 = vmor %vm1609_vm6, %vm1610_vm5 }
 0xed8   :  { %v1605_v36 = vmul.f32 %v2038_v32, %v1604_v33  ;;  %v1747_v33 = vld [vmem:[%s2669_s7 + $0x10] sm:$0xff] }
 0xeda   :  { %v1606_v39 = vmul.f32 0.5, %v1605_v36  ;;  %v1598_v40 = vpop.xlane.xlu1 %1597  ;;  %v1745_v36 = vld [vmem:[%s2669_s7] sm:$0xff] }
 0xedb   :  { %v1600_v41 = vmul.f32 %v1598_v40, %v2341_v38 }
 0xedc   :  { %v1607_v47 = vsub.f32 1.5, %v1606_v39 }
 0xedd   :  { %v1602_v43 = vadd.f32 1e-06, %v1600_v41 }
 0xede   :  { %v1608_v45 = vmul.f32 %v2038_v32, %v1607_v47 }
 0xedf   :  { %2039 = vrsqrt.f32 %v1602_v43  ;;  %vm1619_vm11 = vweird.f32 %v1602_v43 }
 0xee0   :  { %v1612_v48 = vsel %vm1611_vm7, %v2038_v32, %v1608_v45  ;;  %v1748_v32 = vld [vmem:[%s2669_s7 + $0x18] sm:$0xff] }
 0xee1   :  { %v1623_v49 = vmul.f32 %v1612_v48, %v1589_v8  ;;  %1772 = vmatpush.msra.mxu3 %v1748_v32 }
 0xee3   :  { %v1626_v51 = vmul.f32 %v1625_v46, %v1623_v49  ;;  %1773 = vmatpush.msra.mxu3 %v1747_v33 }
 0xee5   :  { %v2040_v10 = vpop.eup %2039  ;;  %v1629_v11 = vadd.f32 %v1628_v50, %v1626_v51  ;;  %1774 = vmatpush.msra.mxu3 %v1746_v35 }
 0xee6   :  { %v1614_v20 = vmul.f32 %v2040_v10, %v1602_v43  ;;  %vm1620_vm10 = vweird.f32 %v2040_v10 }
 0xee7   :  { %1880 = vmatmul.msk.f32.vlgmr.msra.gmra.mxu1 %vm112_vm4, %v1629_v11  ;;  %vm1621_vm12 = vmor %vm1619_vm11, %vm1620_vm10  ;;  %1775 = vmatpush.msra.mxu3 %v1745_v36 }
 0xee8   :  { %v1615_v21 = vmul.f32 %v2040_v10, %v1614_v20 }
 0xeea   :  { %v1616_v22 = vmul.f32 0.5, %v1615_v21 }
 0xeec   :  { %v1617_v57 = vsub.f32 1.5, %v1616_v22 }
 0xeee   :  { %v1618_v58 = vmul.f32 %v2040_v10, %v1617_v57 }
 0xef0   :  { %v1622_v59 = vsel %vm1621_vm12, %v2040_v10, %v1618_v58  ;;  %v1742_v58 = vperm.slane %v2442_v29, 7 }
 0xef1   :  { %v1624_v60 = vmul.f32 %v1622_v59, %v1590_v18 }
 0xef3   :  { %v1627_v61 = vmul.f32 %v1625_v46, %v1624_v60 }
 0xef5   :  { %v1630_v62 = vadd.f32 %v1628_v50, %v1627_v61 }
 0xef7   :  { %1881 = vmatmul.msk.f32.gmra.mxu1 %vm112_vm4, %v1630_v62 }
 0xf64   :  { %v1655_v3 = vpop.f32.mrf.mxu1 }
 0xf65   :  { %v1656_v4 = vadd.f32 %v1655_v3, %v1631_v2 }
 0xf67   :  { %v1661_v31 = vmax.f32 %v1656_v4, 0.0 }
 0xf69   :  { %1882 = vmatmul.msk.f32.vlgmr.msra.gmra.mxu2 %vm845_vm15, %v1661_v31 }
 0xf74   :  { %v1658_v5 = vpop.f32.mrf.mxu1 }
 0xf75   :  { %v1659_v6 = vadd.f32 %v1658_v5, %v1631_v2 }
 0xf77   :  { %v1662_v12 = vmax.f32 %v1659_v6, 0.0 }
 0xf79   :  { %1883 = vmatmul.msk.f32.gmra.mxu2 %vm845_vm15, %v1662_v12 }
 0xfec   :  { %v1687_v53 = vpop.f32.mrf.mxu2 }
 0xfed   :  { %v1688_v54 = vadd.f32 %v1687_v53, %v1663_v52 }
 0xfef   :  { %v1693_v55 = vadd.f32 %v1688_v54, %v1629_v11 }
 0xff1   :  { %v1695_v56 = vsel %vm112_vm4, %v1693_v55, 0.0 }
 0xff2   :  { %1696 = vadd.xlane.f32.xlu1 %v1695_v56 }
 0xffc   :  { %v1690_v19 = vpop.f32.mrf.mxu2 }
 0xffd   :  { %v1691_v7 = vadd.f32 %v1690_v19, %v1663_v52 }
 0xfff   :  { %v1694_v8 = vadd.f32 %v1691_v7, %v1630_v62 }
0x1001   :  { %v1698_v9 = vsel %vm112_vm4, %v1694_v8, 0.0 }
0x1002   :  { %1699 = vadd.xlane.f32.xlu2 %v1698_v9 }
0x1065   :  { %v1697_v13 = vpop.xlane.xlu1 %1696 }
0x1066   :  { %v1701_v14 = vmul.f32 %v1697_v13, %v2341_v38 }
0x1068   :  { %v1703_v15 = vsub.f32 %v1693_v55, %v1701_v14 }
0x106a   :  { %v1705_v18 = vmul.f32 %v1703_v15, %v1703_v15 }
0x106c   :  { %v1707_v16 = vsel %vm112_vm4, %v1705_v18, 0.0 }
0x106d   :  { %1708 = vadd.xlane.f32.xlu1 %v1707_v16 }
0x1075   :  { %v1700_v17 = vpop.xlane.xlu2 %1699 }
0x1076   :  { %v1702_v24 = vmul.f32 %v1700_v17, %v2341_v38 }
0x1078   :  { %v1704_v23 = vsub.f32 %v1694_v8, %v1702_v24 }
0x107a   :  { %v1706_v37 = vmul.f32 %v1704_v23, %v1704_v23 }
0x107c   :  { %v1710_v26 = vsel %vm112_vm4, %v1706_v37, 0.0 }
0x107d   :  { %1711 = vadd.xlane.f32.xlu2 %v1710_v26 }
0x10e0   :  { %v1709_v27 = vpop.xlane.xlu1 %1708 }
0x10e1   :  { %v1713_v30 = vmul.f32 %v1709_v27, %v2341_v38 }
0x10e3   :  { %v1715_v42 = vadd.f32 1e-06, %v1713_v30 }
0x10e5   :  { %2041 = vrsqrt.f32 %v1715_v42  ;;  %vm1723_vm14 = vweird.f32 %v1715_v42 }
0x10eb   :  { %v2042_v34 = vpop.eup %2041 }
0x10ec   :  { %v1718_v25 = vmul.f32 %v2042_v34, %v1715_v42  ;;  %vm1724_vm13 = vweird.f32 %v2042_v34 }
0x10ed   :  { %vm1725_vm15 = vmor %vm1723_vm14, %vm1724_vm13 }
0x10ee   :  { %v1719_v41 = vmul.f32 %v2042_v34, %v1718_v25 }
0x10f0   :  { %v1712_v39 = vpop.xlane.xlu2 %1711  ;;  %v1720_v47 = vmul.f32 0.5, %v1719_v41 }
0x10f1   :  { %v1714_v40 = vmul.f32 %v1712_v39, %v2341_v38  ;;  %v1739_v38 = vperm.slane %v2442_v29, 6 }
0x10f2   :  { %v1721_v43 = vsub.f32 1.5, %v1720_v47 }
0x10f3   :  { %v1716_v28 = vadd.f32 1e-06, %v1714_v40 }
0x10f4   :  { %v1722_v46 = vmul.f32 %v2042_v34, %v1721_v43 }
0x10f5   :  { %2043 = vrsqrt.f32 %v1716_v28  ;;  %vm1733_vm1 = vweird.f32 %v1716_v28 }
0x10f6   :  { %v1726_v50 = vsel %vm1725_vm15, %v2042_v34, %v1722_v46 }
0x10f7   :  { %v1737_v11 = vmul.f32 %v1726_v50, %v1703_v15 }
0x10f9   :  { %v1740_v22 = vmul.f32 %v1739_v38, %v1737_v11 }
0x10fb   :  { %v2044_v44 = vpop.eup %2043  ;;  %v1743_v60 = vadd.f32 %v1742_v58, %v1740_v22 }
0x10fc   :  { %v1728_v45 = vmul.f32 %v2044_v44, %v1716_v28  ;;  %vm1734_vm0 = vweird.f32 %v2044_v44 }
0x10fd   :  { %vm1735_vm2 = vmor %vm1733_vm1, %vm1734_vm0 }
0x10fe   :  { %v1729_v48 = vmul.f32 %v2044_v44, %v1728_v45 }
0x1100   :  { %v1730_v49 = vmul.f32 0.5, %v1729_v48 }
0x1102   :  { %v1731_v51 = vsub.f32 1.5, %v1730_v49 }
0x1104   :  { %v1732_v10 = vmul.f32 %v2044_v44, %v1731_v51 }
0x1106   :  { %v1736_v20 = vsel %vm1735_vm2, %v2044_v44, %v1732_v10 }
0x1107   :  { %v1738_v21 = vmul.f32 %v1736_v20, %v1704_v23 }
0x1109   :  { %v1741_v57 = vmul.f32 %v1739_v38, %v1738_v21 }
0x110b   :  { %v1744_v59 = vadd.f32 %v1742_v58, %v1741_v57 }
0x110d   :  { %v1755_v61 = vrot.slane %v1744_v59, 7 }
0x110f   :  { %v1757_v62 = vsel %vm1756_vm3, %v1755_v61, %v1743_v60 }
0x1110   :  { %1884 = vmatmul.msk.f32.vlgmr.msra.gmra.mxu3 %vm112_vm4, %v1757_v62 }
0x1193   :  { %v1777_v0 = vpop.f32.mrf.mxu3 }
0x1194   :  { %v1778_v29 = vadd.f32 %v1962_v63, %v1777_v0 }
0x1196   :  { %1781 = vst.msk [vmem:[#allocation2] sm:$0x3] %vm1780_vm8, %v1778_v29 }
0x1197   :  { %1792 = dma.vmem_to_hbm [thread:$0]  %s1788_s26, 32, %s1790_s28, [#allocation3]  }
0x1198   :  { %2069 = dma.done.wait [#allocation3], 32  }
0x1199   :  { %2070 = vsyncadd [#allocation3], 4294967264 }
0x119a   :  { %1797 = vsyncpa [#allocation3], 1 }

</bundles_post_ra>
